<compile_context>
chip_gen: v5e
topology: v5e:2x2
jax: 0.10.0
libtpu: 0.0.40
codegen_flags: <defaults>
</compile_context>

<pallas_src>
import functools

import jax
import jax.numpy as jnp
from jax import lax
from jax.experimental import pallas as pl
from jax.experimental.pallas import tpu as pltpu

NUM_CLASSES = 10
C_IN = 64      # Conv2d(64, 64)
C_MID = 64
C_OUT = 128    # Conv2d(64, 128)
LANES = 128    # classifier output padded to a full lane width
MXU_DTYPE = jnp.bfloat16


def _fused_cnn_kernel(x_ref, w1_ref, b1_ref, w2_ref, b2_ref, wl_ref, bl_ref,
                      o_ref, pad1_ref, pad2_ref, *, bn, h, w):
    """Fully fused forward pass for one batch block.

    x_ref : (bn, h, w, C_IN) f32 (NHWC)
    w1_ref: (9*C_IN, C_MID)  bf16   b1_ref: (1, C_MID) f32
    w2_ref: (9*C_MID, C_OUT) bf16   b2_ref: (1, C_OUT) f32
    wl_ref: (C_OUT, LANES)   bf16   bl_ref: (1, LANES) f32
    o_ref : (bn, LANES) f32
    pad1_ref: VMEM (bn, h+2, w+2, C_IN) f32
    pad2_ref: VMEM (bn, h//2+2, w//2+2, C_MID) f32
    """
    h2, w2 = h // 2, w // 2

    # ----- layer 1: zero-pad in VMEM -> im2col -> one MXU matmul -> bias/ReLU -----
    pad1_ref[...] = jnp.zeros_like(pad1_ref)
    x = x_ref[...]
    for i in range(h):                                    # interior rows of padded buf
        pad1_ref[:, i + 1, 1:w + 1, :] = x[:, i, :, :]
    xp1 = pad1_ref[...]                                   # (bn, h+2, w+2, C_IN)

    cols1 = [xp1[:, dy:dy + h, dx:dx + w, :] for dy in range(3) for dx in range(3)]
    p1 = jnp.concatenate(cols1, axis=-1).reshape(bn * h * w, 9 * C_IN)
    a1 = jnp.dot(p1.astype(MXU_DTYPE), w1_ref[...],
                 preferred_element_type=jnp.float32)      # (bn*h*w, C_MID) f32
    a1 = jnp.maximum(a1 + b1_ref[...], 0.0)               # f32 elementwise
    y1 = a1.reshape(bn, h, w, C_MID)

    # ----- 2x2/2 max-pool, written directly into layer 2's zero-padded input ------
    pad2_ref[...] = jnp.zeros_like(pad2_ref)
    for i in range(h2):
        for j in range(w2):
            m = jnp.maximum(
                jnp.maximum(y1[:, 2 * i, 2 * j, :], y1[:, 2 * i, 2 * j + 1, :]),
                jnp.maximum(y1[:, 2 * i + 1, 2 * j, :], y1[:, 2 * i + 1, 2 * j + 1, :]))
            pad2_ref[:, i + 1, j + 1, :] = m

    # ----- layer 2: im2col -> one MXU matmul -> bias/ReLU --------------------------
    xp2 = pad2_ref[...]                                   # (bn, h2+2, w2+2, C_MID)
    cols2 = [xp2[:, dy:dy + h2, dx:dx + w2, :] for dy in range(3) for dx in range(3)]
    p2 = jnp.concatenate(cols2, axis=-1).reshape(bn * h2 * w2, 9 * C_MID)
    a2 = jnp.dot(p2.astype(MXU_DTYPE), w2_ref[...],
                 preferred_element_type=jnp.float32)      # (bn*h2*w2, C_OUT) f32
    a2 = jnp.maximum(a2 + b2_ref[...], 0.0)

    # final 2x2 pool covers the whole h2 x w2 map (2x2 -> 1x1, asserted in wrapper),
    # so pooling == max over all spatial rows; result is already the Flatten output.
    y2 = a2.reshape(bn, h2 * w2, C_OUT)
    feat = y2[:, 0, :]
    for k in range(1, h2 * w2):
        feat = jnp.maximum(feat, y2[:, k, :])             # (bn, C_OUT) f32

    # ----- classifier, lane-padded to 128 columns -> single dense store ------------
    logits = jnp.dot(feat.astype(MXU_DTYPE), wl_ref[...],
                     preferred_element_type=jnp.float32) + bl_ref[...]
    o_ref[...] = logits                                   # dense (bn, 128) store


def cnn_classifier_forward(x_nchw, params):
    n, c, h, w = x_nchw.shape
    # Linear(128, num_classes) after Flatten forces 128 channels * 1x1 post-pool.
    assert c == C_IN and h == 4 and w == 4, (
        "CNNClassifier requires (N, 64, 4, 4) input so Flatten yields 128 features")

    x = jnp.transpose(x_nchw, (0, 2, 3, 1))               # NCHW -> NHWC (f32)

    # Weights reshaped once to im2col layout; matmul operands in bf16.
    w1 = params["w1"].reshape(9 * C_IN, C_MID).astype(MXU_DTYPE)
    w2 = params["w2"].reshape(9 * C_MID, C_OUT).astype(MXU_DTYPE)
    wl = jnp.zeros((C_OUT, LANES), MXU_DTYPE).at[:, :NUM_CLASSES].set(
        params["wl"].astype(MXU_DTYPE))
    bl = jnp.zeros((1, LANES), jnp.float32).at[:, :NUM_CLASSES].set(params["bl"])

    # Batch grid: single step for tiny batches; 8-row blocks for larger batches so the
    # "parallel" axis can shard across v7x's two TensorCores.
    bn = n if (n < 8 or n % 8 != 0) else 8
    grid = (n // bn,)

    kernel = functools.partial(_fused_cnn_kernel, bn=bn, h=h, w=w)
    out = pl.pallas_call(
        kernel,
        out_shape=jax.ShapeDtypeStruct((n, LANES), jnp.float32),
        grid_spec=pltpu.PrefetchScalarGridSpec(
            num_scalar_prefetch=0,
            grid=grid,
            in_specs=[
                pl.BlockSpec((bn, h, w, C_IN), lambda b: (b, 0, 0, 0)),
                pl.BlockSpec((9 * C_IN, C_MID), lambda b: (0, 0)),
                pl.BlockSpec((1, C_MID), lambda b: (0, 0)),
                pl.BlockSpec((9 * C_MID, C_OUT), lambda b: (0, 0)),
                pl.BlockSpec((1, C_OUT), lambda b: (0, 0)),
                pl.BlockSpec((C_OUT, LANES), lambda b: (0, 0)),
                pl.BlockSpec((1, LANES), lambda b: (0, 0)),
            ],
            out_specs=pl.BlockSpec((bn, LANES), lambda b: (b, 0)),
            scratch_shapes=[
                pltpu.VMEM((bn, h + 2, w + 2, C_IN), jnp.float32),
                pltpu.VMEM((bn, h // 2 + 2, w // 2 + 2, C_MID), jnp.float32),
            ],
        ),
        compiler_params=pltpu.CompilerParams(
            dimension_semantics=("parallel",)),
    )(x, w1, params["b1"], w2, params["b2"], wl, bl)
    return out[:, :NUM_CLASSES]


def init_params(key):
    ks = jax.random.split(key, 6)
    scale = 0.05
    return {
        # conv weights stored as (kh, kw, Cin, Cout)
        "w1": scale * jax.random.normal(ks[0], (3, 3, C_IN, C_MID), jnp.float32),
        "b1": scale * jax.random.normal(ks[1], (1, C_MID), jnp.float32),
        "w2": scale * jax.random.normal(ks[2], (3, 3, C_MID, C_OUT), jnp.float32),
        "b2": scale * jax.random.normal(ks[3], (1, C_OUT), jnp.float32),
        "wl": scale * jax.random.normal(ks[4], (C_OUT, NUM_CLASSES), jnp.float32),
        "bl": scale * jax.random.normal(ks[5], (1, NUM_CLASSES), jnp.float32),
    }


# Pure-JAX f32 reference (PyTorch semantics) for correctness checking.
def _reference_forward(x_nchw, params):
    def conv(x, w, b):  # x NHWC, w (kh,kw,Cin,Cout)
        y = lax.conv_general_dilated(
            x, w, window_strides=(1, 1), padding="SAME",
            dimension_numbers=("NHWC", "HWIO", "NHWC"))
        y = jnp.maximum(y + b.reshape(1, 1, 1, -1), 0.0)
        return lax.reduce_window(y, -jnp.inf, lax.max,
                                 (1, 2, 2, 1), (1, 2, 2, 1), "VALID")
    x = jnp.transpose(x_nchw, (0, 2, 3, 1))
    x = conv(x, params["w1"], params["b1"])
    x = conv(x, params["w2"], params["b2"])
    x = x.reshape(x.shape[0], -1)
    return x @ params["wl"] + params["bl"]


if __name__ == "__main__":
    key = jax.random.PRNGKey(0)
    kx, kp = jax.random.split(key)
    # Conv2d(64, ...) + Linear(128, nc) imply input (N, 64, 4, 4): 1x1 after two pools.
    x = jax.random.normal(kx, (2, C_IN, 4, 4), jnp.float32)   # NCHW like PyTorch
    params = init_params(kp)

    fwd = jax.jit(cnn_classifier_forward)
    out = jax.block_until_ready(fwd(x, params))
    assert out.shape == (2, NUM_CLASSES)

    ref = jax.block_until_ready(_reference_forward(x, params))
    # bf16 MXU operands (f32 accumulation) => relaxed tolerance vs the pure-f32 reference.
    assert jnp.allclose(out, ref, atol=1e-1, rtol=1e-1), "mismatch vs reference"

    print("KERNEL_OK")
</pallas_src>

<mosaic_0001>
module attributes {stable_mosaic.version = 11 : i64} {
  func.func @_fused_cnn_kernel(%arg0: i32, %arg1: memref<2x4x4x64xf32, #tpu.memory_space<vmem>>, %arg2: memref<576x64xbf16, #tpu.memory_space<vmem>>, %arg3: memref<1x64xf32, #tpu.memory_space<vmem>>, %arg4: memref<576x128xbf16, #tpu.memory_space<vmem>>, %arg5: memref<1x128xf32, #tpu.memory_space<vmem>>, %arg6: memref<128x128xbf16, #tpu.memory_space<vmem>>, %arg7: memref<1x128xf32, #tpu.memory_space<vmem>>, %arg8: memref<2x128xf32, #tpu.memory_space<vmem>>, %arg9: memref<2x6x6x64xf32, #tpu.memory_space<vmem>>, %arg10: memref<2x4x4x64xf32, #tpu.memory_space<vmem>>) attributes {dimension_semantics = [#tpu.dimension_semantics<parallel>], iteration_bounds = array<i64: 1>, scalar_prefetch = 0 : i64, scratch_operands = 2 : i64, tpu.core_type = #tpu.core_type<tc>, window_params = [{transform_indices = @transform_0, window_bounds = array<i64: 2, 4, 4, 64>}, {pipeline_mode = #tpu.pipeline_mode<synchronous>, transform_indices = @transform_1, window_bounds = array<i64: 576, 64>}, {pipeline_mode = #tpu.pipeline_mode<synchronous>, transform_indices = @transform_2, window_bounds = array<i64: 1, 64>}, {pipeline_mode = #tpu.pipeline_mode<synchronous>, transform_indices = @transform_3, window_bounds = array<i64: 576, 128>}, {pipeline_mode = #tpu.pipeline_mode<synchronous>, transform_indices = @transform_4, window_bounds = array<i64: 1, 128>}, {pipeline_mode = #tpu.pipeline_mode<synchronous>, transform_indices = @transform_5, window_bounds = array<i64: 128, 128>}, {pipeline_mode = #tpu.pipeline_mode<synchronous>, transform_indices = @transform_6, window_bounds = array<i64: 1, 128>}, {transform_indices = @transform_7, window_bounds = array<i64: 2, 128>}]} {
    %cst = arith.constant 0.000000e+00 : f32
    %0 = vector.broadcast %cst : f32 to vector<2x6x6x64xf32>
    %c0 = arith.constant 0 : index
    %c0_0 = arith.constant 0 : index
    %c0_1 = arith.constant 0 : index
    %c0_2 = arith.constant 0 : index
    %1 = vector.load %arg9[%c0, %c0_0, %c0_1, %c0_2] : memref<2x6x6x64xf32, #tpu.memory_space<vmem>>, vector<2x6x6x64xf32>
    tpu.vector_store %arg9[%c0, %c0_0, %c0_1, %c0_2], %0 {strides = array<i32>} : memref<2x6x6x64xf32, #tpu.memory_space<vmem>>, vector<2x6x6x64xf32>,
    %c0_3 = arith.constant 0 : index
    %c0_4 = arith.constant 0 : index
    %c0_5 = arith.constant 0 : index
    %c0_6 = arith.constant 0 : index
    %2 = vector.load %arg1[%c0_3, %c0_4, %c0_5, %c0_6] : memref<2x4x4x64xf32, #tpu.memory_space<vmem>>, vector<2x4x4x64xf32>
    %3 = vector.extract_strided_slice %2 {offsets = [0, 0, 0, 0], sizes = [2, 1, 4, 64], strides = [1, 1, 1, 1]} : vector<2x4x4x64xf32> to vector<2x1x4x64xf32>
    %4 = vector.shape_cast %3 : vector<2x1x4x64xf32> to vector<2x4x64xf32>
    %c0_7 = arith.constant 0 : index
    %c1 = arith.constant 1 : index
    %c1_8 = arith.constant 1 : index
    %c0_9 = arith.constant 0 : index
    %5 = vector.load %arg9[%c0_7, %c1, %c1_8, %c0_9] : memref<2x6x6x64xf32, #tpu.memory_space<vmem>>, vector<2x1x4x64xf32>
    %6 = vector.shape_cast %5 : vector<2x1x4x64xf32> to vector<2x4x64xf32>
    %7 = vector.shape_cast %4 : vector<2x4x64xf32> to vector<2x1x4x64xf32>
    tpu.vector_store %arg9[%c0_7, %c1, %c1_8, %c0_9], %7 {strides = array<i32>} : memref<2x6x6x64xf32, #tpu.memory_space<vmem>>, vector<2x1x4x64xf32>,
    %8 = vector.extract_strided_slice %2 {offsets = [0, 1, 0, 0], sizes = [2, 1, 4, 64], strides = [1, 1, 1, 1]} : vector<2x4x4x64xf32> to vector<2x1x4x64xf32>
    %9 = vector.shape_cast %8 : vector<2x1x4x64xf32> to vector<2x4x64xf32>
    %c0_10 = arith.constant 0 : index
    %c2 = arith.constant 2 : index
    %c1_11 = arith.constant 1 : index
    %c0_12 = arith.constant 0 : index
    %10 = vector.load %arg9[%c0_10, %c2, %c1_11, %c0_12] : memref<2x6x6x64xf32, #tpu.memory_space<vmem>>, vector<2x1x4x64xf32>
    %11 = vector.shape_cast %10 : vector<2x1x4x64xf32> to vector<2x4x64xf32>
    %12 = vector.shape_cast %9 : vector<2x4x64xf32> to vector<2x1x4x64xf32>
    tpu.vector_store %arg9[%c0_10, %c2, %c1_11, %c0_12], %12 {strides = array<i32>} : memref<2x6x6x64xf32, #tpu.memory_space<vmem>>, vector<2x1x4x64xf32>,
    %13 = vector.extract_strided_slice %2 {offsets = [0, 2, 0, 0], sizes = [2, 1, 4, 64], strides = [1, 1, 1, 1]} : vector<2x4x4x64xf32> to vector<2x1x4x64xf32>
    %14 = vector.shape_cast %13 : vector<2x1x4x64xf32> to vector<2x4x64xf32>
    %c0_13 = arith.constant 0 : index
    %c3 = arith.constant 3 : index
    %c1_14 = arith.constant 1 : index
    %c0_15 = arith.constant 0 : index
    %15 = vector.load %arg9[%c0_13, %c3, %c1_14, %c0_15] : memref<2x6x6x64xf32, #tpu.memory_space<vmem>>, vector<2x1x4x64xf32>
    %16 = vector.shape_cast %15 : vector<2x1x4x64xf32> to vector<2x4x64xf32>
    %17 = vector.shape_cast %14 : vector<2x4x64xf32> to vector<2x1x4x64xf32>
    tpu.vector_store %arg9[%c0_13, %c3, %c1_14, %c0_15], %17 {strides = array<i32>} : memref<2x6x6x64xf32, #tpu.memory_space<vmem>>, vector<2x1x4x64xf32>,
    %18 = vector.extract_strided_slice %2 {offsets = [0, 3, 0, 0], sizes = [2, 1, 4, 64], strides = [1, 1, 1, 1]} : vector<2x4x4x64xf32> to vector<2x1x4x64xf32>
    %19 = vector.shape_cast %18 : vector<2x1x4x64xf32> to vector<2x4x64xf32>
    %c0_16 = arith.constant 0 : index
    %c4 = arith.constant 4 : index
    %c1_17 = arith.constant 1 : index
    %c0_18 = arith.constant 0 : index
    %20 = vector.load %arg9[%c0_16, %c4, %c1_17, %c0_18] : memref<2x6x6x64xf32, #tpu.memory_space<vmem>>, vector<2x1x4x64xf32>
    %21 = vector.shape_cast %20 : vector<2x1x4x64xf32> to vector<2x4x64xf32>
    %22 = vector.shape_cast %19 : vector<2x4x64xf32> to vector<2x1x4x64xf32>
    tpu.vector_store %arg9[%c0_16, %c4, %c1_17, %c0_18], %22 {strides = array<i32>} : memref<2x6x6x64xf32, #tpu.memory_space<vmem>>, vector<2x1x4x64xf32>,
    %c0_19 = arith.constant 0 : index
    %c0_20 = arith.constant 0 : index
    %c0_21 = arith.constant 0 : index
    %c0_22 = arith.constant 0 : index
    %23 = vector.load %arg9[%c0_19, %c0_20, %c0_21, %c0_22] : memref<2x6x6x64xf32, #tpu.memory_space<vmem>>, vector<2x6x6x64xf32>
    %24 = vector.extract_strided_slice %23 {offsets = [0, 0, 0, 0], sizes = [2, 4, 4, 64], strides = [1, 1, 1, 1]} : vector<2x6x6x64xf32> to vector<2x4x4x64xf32>
    %25 = vector.extract_strided_slice %23 {offsets = [0, 0, 1, 0], sizes = [2, 4, 4, 64], strides = [1, 1, 1, 1]} : vector<2x6x6x64xf32> to vector<2x4x4x64xf32>
    %26 = vector.extract_strided_slice %23 {offsets = [0, 0, 2, 0], sizes = [2, 4, 4, 64], strides = [1, 1, 1, 1]} : vector<2x6x6x64xf32> to vector<2x4x4x64xf32>
    %27 = vector.extract_strided_slice %23 {offsets = [0, 1, 0, 0], sizes = [2, 4, 4, 64], strides = [1, 1, 1, 1]} : vector<2x6x6x64xf32> to vector<2x4x4x64xf32>
    %28 = vector.extract_strided_slice %23 {offsets = [0, 1, 1, 0], sizes = [2, 4, 4, 64], strides = [1, 1, 1, 1]} : vector<2x6x6x64xf32> to vector<2x4x4x64xf32>
    %29 = vector.extract_strided_slice %23 {offsets = [0, 1, 2, 0], sizes = [2, 4, 4, 64], strides = [1, 1, 1, 1]} : vector<2x6x6x64xf32> to vector<2x4x4x64xf32>
    %30 = vector.extract_strided_slice %23 {offsets = [0, 2, 0, 0], sizes = [2, 4, 4, 64], strides = [1, 1, 1, 1]} : vector<2x6x6x64xf32> to vector<2x4x4x64xf32>
    %31 = vector.extract_strided_slice %23 {offsets = [0, 2, 1, 0], sizes = [2, 4, 4, 64], strides = [1, 1, 1, 1]} : vector<2x6x6x64xf32> to vector<2x4x4x64xf32>
    %32 = vector.extract_strided_slice %23 {offsets = [0, 2, 2, 0], sizes = [2, 4, 4, 64], strides = [1, 1, 1, 1]} : vector<2x6x6x64xf32> to vector<2x4x4x64xf32>
    %33 = tpu.concatenate %24, %25, %26, %27, %28, %29, %30, %31, %32 in 3 : vector<2x4x4x64xf32>, vector<2x4x4x64xf32>, vector<2x4x4x64xf32>, vector<2x4x4x64xf32>, vector<2x4x4x64xf32>, vector<2x4x4x64xf32>, vector<2x4x4x64xf32>, vector<2x4x4x64xf32>, vector<2x4x4x64xf32> -> vector<2x4x4x576xf32>
    %34 = vector.shape_cast %33 : vector<2x4x4x576xf32> to vector<32x576xf32>
    %35 = arith.truncf %34 : vector<32x576xf32> to vector<32x576xbf16>
    %c0_23 = arith.constant 0 : index
    %c0_24 = arith.constant 0 : index
    %36 = vector.load %arg2[%c0_23, %c0_24] : memref<576x64xbf16, #tpu.memory_space<vmem>>, vector<576x64xbf16>
    %cst_25 = arith.constant dense<0.000000e+00> : vector<32x64xf32>
    %37 = tpu.matmul %35, %36, %cst_25 {dimension_numbers = #tpu.dot_dimension_numbers<[1], [0], [0], [1], [0, 0, 1, 1], [], []>} : vector<32x576xbf16>, vector<576x64xbf16>, vector<32x64xf32> -> vector<32x64xf32>
    %c0_26 = arith.constant 0 : index
    %c0_27 = arith.constant 0 : index
    %38 = vector.load %arg3[%c0_26, %c0_27] : memref<1x64xf32, #tpu.memory_space<vmem>>, vector<1x64xf32>
    %39 = vector.broadcast %38 : vector<1x64xf32> to vector<32x64xf32>
    %40 = arith.addf %37, %39 : vector<32x64xf32>
    %cst_28 = arith.constant 0.000000e+00 : f32
    %41 = vector.broadcast %cst_28 : f32 to vector<32x64xf32>
    %42 = arith.maximumf %40, %41 : vector<32x64xf32>
    %43 = vector.shape_cast %42 : vector<32x64xf32> to vector<2x4x4x64xf32>
    %cst_29 = arith.constant 0.000000e+00 : f32
    %44 = vector.broadcast %cst_29 : f32 to vector<2x4x4x64xf32>
    %c0_30 = arith.constant 0 : index
    %c0_31 = arith.constant 0 : index
    %c0_32 = arith.constant 0 : index
    %c0_33 = arith.constant 0 : index
    %45 = vector.load %arg10[%c0_30, %c0_31, %c0_32, %c0_33] : memref<2x4x4x64xf32, #tpu.memory_space<vmem>>, vector<2x4x4x64xf32>
    tpu.vector_store %arg10[%c0_30, %c0_31, %c0_32, %c0_33], %44 {strides = array<i32>} : memref<2x4x4x64xf32, #tpu.memory_space<vmem>>, vector<2x4x4x64xf32>,
    %46 = vector.extract_strided_slice %43 {offsets = [0, 0, 0, 0], sizes = [2, 1, 1, 64], strides = [1, 1, 1, 1]} : vector<2x4x4x64xf32> to vector<2x1x1x64xf32>
    %47 = vector.shape_cast %46 : vector<2x1x1x64xf32> to vector<2x64xf32>
    %48 = vector.extract_strided_slice %43 {offsets = [0, 0, 1, 0], sizes = [2, 1, 1, 64], strides = [1, 1, 1, 1]} : vector<2x4x4x64xf32> to vector<2x1x1x64xf32>
    %49 = vector.shape_cast %48 : vector<2x1x1x64xf32> to vector<2x64xf32>
    %50 = arith.maximumf %47, %49 : vector<2x64xf32>
    %51 = vector.extract_strided_slice %43 {offsets = [0, 1, 0, 0], sizes = [2, 1, 1, 64], strides = [1, 1, 1, 1]} : vector<2x4x4x64xf32> to vector<2x1x1x64xf32>
    %52 = vector.shape_cast %51 : vector<2x1x1x64xf32> to vector<2x64xf32>
    %53 = vector.extract_strided_slice %43 {offsets = [0, 1, 1, 0], sizes = [2, 1, 1, 64], strides = [1, 1, 1, 1]} : vector<2x4x4x64xf32> to vector<2x1x1x64xf32>
    %54 = vector.shape_cast %53 : vector<2x1x1x64xf32> to vector<2x64xf32>
    %55 = arith.maximumf %52, %54 : vector<2x64xf32>
    %56 = arith.maximumf %50, %55 : vector<2x64xf32>
    %c0_34 = arith.constant 0 : index
    %c1_35 = arith.constant 1 : index
    %c1_36 = arith.constant 1 : index
    %c0_37 = arith.constant 0 : index
    %57 = vector.load %arg10[%c0_34, %c1_35, %c1_36, %c0_37] : memref<2x4x4x64xf32, #tpu.memory_space<vmem>>, vector<2x1x1x64xf32>
    %58 = vector.shape_cast %57 : vector<2x1x1x64xf32> to vector<2x64xf32>
    %59 = vector.shape_cast %56 : vector<2x64xf32> to vector<2x1x1x64xf32>
    tpu.vector_store %arg10[%c0_34, %c1_35, %c1_36, %c0_37], %59 {strides = array<i32>} : memref<2x4x4x64xf32, #tpu.memory_space<vmem>>, vector<2x1x1x64xf32>,
    %60 = vector.extract_strided_slice %43 {offsets = [0, 0, 2, 0], sizes = [2, 1, 1, 64], strides = [1, 1, 1, 1]} : vector<2x4x4x64xf32> to vector<2x1x1x64xf32>
    %61 = vector.shape_cast %60 : vector<2x1x1x64xf32> to vector<2x64xf32>
    %62 = vector.extract_strided_slice %43 {offsets = [0, 0, 3, 0], sizes = [2, 1, 1, 64], strides = [1, 1, 1, 1]} : vector<2x4x4x64xf32> to vector<2x1x1x64xf32>
    %63 = vector.shape_cast %62 : vector<2x1x1x64xf32> to vector<2x64xf32>
    %64 = arith.maximumf %61, %63 : vector<2x64xf32>
    %65 = vector.extract_strided_slice %43 {offsets = [0, 1, 2, 0], sizes = [2, 1, 1, 64], strides = [1, 1, 1, 1]} : vector<2x4x4x64xf32> to vector<2x1x1x64xf32>
    %66 = vector.shape_cast %65 : vector<2x1x1x64xf32> to vector<2x64xf32>
    %67 = vector.extract_strided_slice %43 {offsets = [0, 1, 3, 0], sizes = [2, 1, 1, 64], strides = [1, 1, 1, 1]} : vector<2x4x4x64xf32> to vector<2x1x1x64xf32>
    %68 = vector.shape_cast %67 : vector<2x1x1x64xf32> to vector<2x64xf32>
    %69 = arith.maximumf %66, %68 : vector<2x64xf32>
    %70 = arith.maximumf %64, %69 : vector<2x64xf32>
    %c0_38 = arith.constant 0 : index
    %c1_39 = arith.constant 1 : index
    %c2_40 = arith.constant 2 : index
    %c0_41 = arith.constant 0 : index
    %71 = vector.load %arg10[%c0_38, %c1_39, %c2_40, %c0_41] : memref<2x4x4x64xf32, #tpu.memory_space<vmem>>, vector<2x1x1x64xf32>
    %72 = vector.shape_cast %71 : vector<2x1x1x64xf32> to vector<2x64xf32>
    %73 = vector.shape_cast %70 : vector<2x64xf32> to vector<2x1x1x64xf32>
    tpu.vector_store %arg10[%c0_38, %c1_39, %c2_40, %c0_41], %73 {strides = array<i32>} : memref<2x4x4x64xf32, #tpu.memory_space<vmem>>, vector<2x1x1x64xf32>,
    %74 = vector.extract_strided_slice %43 {offsets = [0, 2, 0, 0], sizes = [2, 1, 1, 64], strides = [1, 1, 1, 1]} : vector<2x4x4x64xf32> to vector<2x1x1x64xf32>
    %75 = vector.shape_cast %74 : vector<2x1x1x64xf32> to vector<2x64xf32>
    %76 = vector.extract_strided_slice %43 {offsets = [0, 2, 1, 0], sizes = [2, 1, 1, 64], strides = [1, 1, 1, 1]} : vector<2x4x4x64xf32> to vector<2x1x1x64xf32>
    %77 = vector.shape_cast %76 : vector<2x1x1x64xf32> to vector<2x64xf32>
    %78 = arith.maximumf %75, %77 : vector<2x64xf32>
    %79 = vector.extract_strided_slice %43 {offsets = [0, 3, 0, 0], sizes = [2, 1, 1, 64], strides = [1, 1, 1, 1]} : vector<2x4x4x64xf32> to vector<2x1x1x64xf32>
    %80 = vector.shape_cast %79 : vector<2x1x1x64xf32> to vector<2x64xf32>
    %81 = vector.extract_strided_slice %43 {offsets = [0, 3, 1, 0], sizes = [2, 1, 1, 64], strides = [1, 1, 1, 1]} : vector<2x4x4x64xf32> to vector<2x1x1x64xf32>
    %82 = vector.shape_cast %81 : vector<2x1x1x64xf32> to vector<2x64xf32>
    %83 = arith.maximumf %80, %82 : vector<2x64xf32>
    %84 = arith.maximumf %78, %83 : vector<2x64xf32>
    %c0_42 = arith.constant 0 : index
    %c2_43 = arith.constant 2 : index
    %c1_44 = arith.constant 1 : index
    %c0_45 = arith.constant 0 : index
    %85 = vector.load %arg10[%c0_42, %c2_43, %c1_44, %c0_45] : memref<2x4x4x64xf32, #tpu.memory_space<vmem>>, vector<2x1x1x64xf32>
    %86 = vector.shape_cast %85 : vector<2x1x1x64xf32> to vector<2x64xf32>
    %87 = vector.shape_cast %84 : vector<2x64xf32> to vector<2x1x1x64xf32>
    tpu.vector_store %arg10[%c0_42, %c2_43, %c1_44, %c0_45], %87 {strides = array<i32>} : memref<2x4x4x64xf32, #tpu.memory_space<vmem>>, vector<2x1x1x64xf32>,
    %88 = vector.extract_strided_slice %43 {offsets = [0, 2, 2, 0], sizes = [2, 1, 1, 64], strides = [1, 1, 1, 1]} : vector<2x4x4x64xf32> to vector<2x1x1x64xf32>
    %89 = vector.shape_cast %88 : vector<2x1x1x64xf32> to vector<2x64xf32>
    %90 = vector.extract_strided_slice %43 {offsets = [0, 2, 3, 0], sizes = [2, 1, 1, 64], strides = [1, 1, 1, 1]} : vector<2x4x4x64xf32> to vector<2x1x1x64xf32>
    %91 = vector.shape_cast %90 : vector<2x1x1x64xf32> to vector<2x64xf32>
    %92 = arith.maximumf %89, %91 : vector<2x64xf32>
    %93 = vector.extract_strided_slice %43 {offsets = [0, 3, 2, 0], sizes = [2, 1, 1, 64], strides = [1, 1, 1, 1]} : vector<2x4x4x64xf32> to vector<2x1x1x64xf32>
    %94 = vector.shape_cast %93 : vector<2x1x1x64xf32> to vector<2x64xf32>
    %95 = vector.extract_strided_slice %43 {offsets = [0, 3, 3, 0], sizes = [2, 1, 1, 64], strides = [1, 1, 1, 1]} : vector<2x4x4x64xf32> to vector<2x1x1x64xf32>
    %96 = vector.shape_cast %95 : vector<2x1x1x64xf32> to vector<2x64xf32>
    %97 = arith.maximumf %94, %96 : vector<2x64xf32>
    %98 = arith.maximumf %92, %97 : vector<2x64xf32>
    %c0_46 = arith.constant 0 : index
    %c2_47 = arith.constant 2 : index
    %c2_48 = arith.constant 2 : index
    %c0_49 = arith.constant 0 : index
    %99 = vector.load %arg10[%c0_46, %c2_47, %c2_48, %c0_49] : memref<2x4x4x64xf32, #tpu.memory_space<vmem>>, vector<2x1x1x64xf32>
    %100 = vector.shape_cast %99 : vector<2x1x1x64xf32> to vector<2x64xf32>
    %101 = vector.shape_cast %98 : vector<2x64xf32> to vector<2x1x1x64xf32>
    tpu.vector_store %arg10[%c0_46, %c2_47, %c2_48, %c0_49], %101 {strides = array<i32>} : memref<2x4x4x64xf32, #tpu.memory_space<vmem>>, vector<2x1x1x64xf32>,
    %c0_50 = arith.constant 0 : index
    %c0_51 = arith.constant 0 : index
    %c0_52 = arith.constant 0 : index
    %c0_53 = arith.constant 0 : index
    %102 = vector.load %arg10[%c0_50, %c0_51, %c0_52, %c0_53] : memref<2x4x4x64xf32, #tpu.memory_space<vmem>>, vector<2x4x4x64xf32>
    %103 = vector.extract_strided_slice %102 {offsets = [0, 0, 0, 0], sizes = [2, 2, 2, 64], strides = [1, 1, 1, 1]} : vector<2x4x4x64xf32> to vector<2x2x2x64xf32>
    %104 = vector.extract_strided_slice %102 {offsets = [0, 0, 1, 0], sizes = [2, 2, 2, 64], strides = [1, 1, 1, 1]} : vector<2x4x4x64xf32> to vector<2x2x2x64xf32>
    %105 = vector.extract_strided_slice %102 {offsets = [0, 0, 2, 0], sizes = [2, 2, 2, 64], strides = [1, 1, 1, 1]} : vector<2x4x4x64xf32> to vector<2x2x2x64xf32>
    %106 = vector.extract_strided_slice %102 {offsets = [0, 1, 0, 0], sizes = [2, 2, 2, 64], strides = [1, 1, 1, 1]} : vector<2x4x4x64xf32> to vector<2x2x2x64xf32>
    %107 = vector.extract_strided_slice %102 {offsets = [0, 1, 1, 0], sizes = [2, 2, 2, 64], strides = [1, 1, 1, 1]} : vector<2x4x4x64xf32> to vector<2x2x2x64xf32>
    %108 = vector.extract_strided_slice %102 {offsets = [0, 1, 2, 0], sizes = [2, 2, 2, 64], strides = [1, 1, 1, 1]} : vector<2x4x4x64xf32> to vector<2x2x2x64xf32>
    %109 = vector.extract_strided_slice %102 {offsets = [0, 2, 0, 0], sizes = [2, 2, 2, 64], strides = [1, 1, 1, 1]} : vector<2x4x4x64xf32> to vector<2x2x2x64xf32>
    %110 = vector.extract_strided_slice %102 {offsets = [0, 2, 1, 0], sizes = [2, 2, 2, 64], strides = [1, 1, 1, 1]} : vector<2x4x4x64xf32> to vector<2x2x2x64xf32>
    %111 = vector.extract_strided_slice %102 {offsets = [0, 2, 2, 0], sizes = [2, 2, 2, 64], strides = [1, 1, 1, 1]} : vector<2x4x4x64xf32> to vector<2x2x2x64xf32>
    %112 = tpu.concatenate %103, %104, %105, %106, %107, %108, %109, %110, %111 in 3 : vector<2x2x2x64xf32>, vector<2x2x2x64xf32>, vector<2x2x2x64xf32>, vector<2x2x2x64xf32>, vector<2x2x2x64xf32>, vector<2x2x2x64xf32>, vector<2x2x2x64xf32>, vector<2x2x2x64xf32>, vector<2x2x2x64xf32> -> vector<2x2x2x576xf32>
    %113 = vector.shape_cast %112 : vector<2x2x2x576xf32> to vector<8x576xf32>
    %114 = arith.truncf %113 : vector<8x576xf32> to vector<8x576xbf16>
    %c0_54 = arith.constant 0 : index
    %c0_55 = arith.constant 0 : index
    %115 = vector.load %arg4[%c0_54, %c0_55] : memref<576x128xbf16, #tpu.memory_space<vmem>>, vector<576x128xbf16>
    %cst_56 = arith.constant dense<0.000000e+00> : vector<8x128xf32>
    %116 = tpu.matmul %114, %115, %cst_56 {dimension_numbers = #tpu.dot_dimension_numbers<[1], [0], [0], [1], [0, 0, 1, 1], [], []>} : vector<8x576xbf16>, vector<576x128xbf16>, vector<8x128xf32> -> vector<8x128xf32>
    %c0_57 = arith.constant 0 : index
    %c0_58 = arith.constant 0 : index
    %117 = vector.load %arg5[%c0_57, %c0_58] : memref<1x128xf32, #tpu.memory_space<vmem>>, vector<1x128xf32>
    %118 = vector.broadcast %117 : vector<1x128xf32> to vector<8x128xf32>
    %119 = arith.addf %116, %118 : vector<8x128xf32>
    %cst_59 = arith.constant 0.000000e+00 : f32
    %120 = vector.broadcast %cst_59 : f32 to vector<8x128xf32>
    %121 = arith.maximumf %119, %120 : vector<8x128xf32>
    %122 = vector.shape_cast %121 : vector<8x128xf32> to vector<2x4x128xf32>
    %123 = vector.extract_strided_slice %122 {offsets = [0, 0, 0], sizes = [2, 1, 128], strides = [1, 1, 1]} : vector<2x4x128xf32> to vector<2x1x128xf32>
    %124 = vector.shape_cast %123 : vector<2x1x128xf32> to vector<2x128xf32>
    %125 = vector.extract_strided_slice %122 {offsets = [0, 1, 0], sizes = [2, 1, 128], strides = [1, 1, 1]} : vector<2x4x128xf32> to vector<2x1x128xf32>
    %126 = vector.shape_cast %125 : vector<2x1x128xf32> to vector<2x128xf32>
    %127 = arith.maximumf %124, %126 : vector<2x128xf32>
    %128 = vector.extract_strided_slice %122 {offsets = [0, 2, 0], sizes = [2, 1, 128], strides = [1, 1, 1]} : vector<2x4x128xf32> to vector<2x1x128xf32>
    %129 = vector.shape_cast %128 : vector<2x1x128xf32> to vector<2x128xf32>
    %130 = arith.maximumf %127, %129 : vector<2x128xf32>
    %131 = vector.extract_strided_slice %122 {offsets = [0, 3, 0], sizes = [2, 1, 128], strides = [1, 1, 1]} : vector<2x4x128xf32> to vector<2x1x128xf32>
    %132 = vector.shape_cast %131 : vector<2x1x128xf32> to vector<2x128xf32>
    %133 = arith.maximumf %130, %132 : vector<2x128xf32>
    %134 = arith.truncf %133 : vector<2x128xf32> to vector<2x128xbf16>
    %c0_60 = arith.constant 0 : index
    %c0_61 = arith.constant 0 : index
    %135 = vector.load %arg6[%c0_60, %c0_61] : memref<128x128xbf16, #tpu.memory_space<vmem>>, vector<128x128xbf16>
    %cst_62 = arith.constant dense<0.000000e+00> : vector<2x128xf32>
    %136 = tpu.matmul %134, %135, %cst_62 {dimension_numbers = #tpu.dot_dimension_numbers<[1], [0], [0], [1], [0, 0, 1, 1], [], []>} : vector<2x128xbf16>, vector<128x128xbf16>, vector<2x128xf32> -> vector<2x128xf32>
    %c0_63 = arith.constant 0 : index
    %c0_64 = arith.constant 0 : index
    %137 = vector.load %arg7[%c0_63, %c0_64] : memref<1x128xf32, #tpu.memory_space<vmem>>, vector<1x128xf32>
    %138 = vector.broadcast %137 : vector<1x128xf32> to vector<2x128xf32>
    %139 = arith.addf %136, %138 : vector<2x128xf32>
    %c0_65 = arith.constant 0 : index
    %c0_66 = arith.constant 0 : index
    %140 = vector.load %arg8[%c0_65, %c0_66] : memref<2x128xf32, #tpu.memory_space<vmem>>, vector<2x128xf32>
    tpu.vector_store %arg8[%c0_65, %c0_66], %139 {strides = array<i32>} : memref<2x128xf32, #tpu.memory_space<vmem>>, vector<2x128xf32>,
    return
  }
  func.func @transform_0(%arg0: i32) -> (i32, i32, i32, i32) {
    %c0_i32 = arith.constant 0 : i32
    %c0_i32_0 = arith.constant 0 : i32
    %c0_i32_1 = arith.constant 0 : i32
    %c0_i32_2 = arith.constant 0 : i32
    return %arg0, %c0_i32, %c0_i32_0, %c0_i32_1 : i32, i32, i32, i32
  }
  func.func @transform_1(%arg0: i32) -> (i32, i32) {
    %c0_i32 = arith.constant 0 : i32
    %c0_i32_0 = arith.constant 0 : i32
    %c0_i32_1 = arith.constant 0 : i32
    return %c0_i32, %c0_i32_0 : i32, i32
  }
  func.func @transform_2(%arg0: i32) -> (i32, i32) {
    %c0_i32 = arith.constant 0 : i32
    %c0_i32_0 = arith.constant 0 : i32
    %c0_i32_1 = arith.constant 0 : i32
    return %c0_i32, %c0_i32_0 : i32, i32
  }
  func.func @transform_3(%arg0: i32) -> (i32, i32) {
    %c0_i32 = arith.constant 0 : i32
    %c0_i32_0 = arith.constant 0 : i32
    %c0_i32_1 = arith.constant 0 : i32
    return %c0_i32, %c0_i32_0 : i32, i32
  }
  func.func @transform_4(%arg0: i32) -> (i32, i32) {
    %c0_i32 = arith.constant 0 : i32
    %c0_i32_0 = arith.constant 0 : i32
    %c0_i32_1 = arith.constant 0 : i32
    return %c0_i32, %c0_i32_0 : i32, i32
  }
  func.func @transform_5(%arg0: i32) -> (i32, i32) {
    %c0_i32 = arith.constant 0 : i32
    %c0_i32_0 = arith.constant 0 : i32
    %c0_i32_1 = arith.constant 0 : i32
    return %c0_i32, %c0_i32_0 : i32, i32
  }
  func.func @transform_6(%arg0: i32) -> (i32, i32) {
    %c0_i32 = arith.constant 0 : i32
    %c0_i32_0 = arith.constant 0 : i32
    %c0_i32_1 = arith.constant 0 : i32
    return %c0_i32, %c0_i32_0 : i32, i32
  }
  func.func @transform_7(%arg0: i32) -> (i32, i32) {
    %c0_i32 = arith.constant 0 : i32
    %c0_i32_0 = arith.constant 0 : i32
    return %arg0, %c0_i32 : i32, i32
  }
}

</mosaic_0001>

<bundles_post_ra>
// kernel: cnn_classifier_forward.1
= control target key start
LH: loop header
LB: loop body
LE: loop exit
PB: predicated region body
PF: predicated region fallthrough
CT: control target
= control target key end

     0   :  { %vm28_vm0 = vcmask 521216   ;;  %vm50_vm1 = vcmask 519168   ;;  %v1968_v1 = vmov 0.0   ;;  %s2670_s0 = inlined_call_operand.vmem [shape: f32[2,4,4,64], index: 0, kind: input, shape index: {}]   ;;  %s2671_s1 = inlined_call_operand.vmem [shape: bf16[576,64], index: 1, kind: input, shape index: {}]   ;;  %s2672_s2 = inlined_call_operand.vmem [shape: f32[1,64], index: 2, kind: input, shape index: {}]   ;;  %s2673_s3 = inlined_call_operand.vmem [shape: bf16[576,128], index: 3, kind: input, shape index: {}]   ;;  %s2674_s4 = inlined_call_operand.vmem [shape: f32[1,128], index: 4, kind: input, shape index: {}]   ;;  %s2675_s5 = inlined_call_operand.vmem [shape: bf16[128,128], index: 5, kind: input, shape index: {}]   ;;  %s2676_s6 = inlined_call_operand.vmem [shape: f32[1,128], index: 6, kind: input, shape index: {}]   ;;  %s2677_s7 = inlined_call_operand.hbm [shape: f32[2,128], index: 7, kind: output, shape index: {}]  }
   0x1   :  { %v41_v0 = vld [vmem:[%s2670_s0] sm:$0xf]  ;;  %30 = vst.msk [vmem:[#allocation2 + $0x8] sm:$0x3f] %vm28_vm0, %v1968_v1 }
   0x2   :  { %51 = vst.msk [vmem:[#allocation2 + $0x9] sm:$0xf] %vm50_vm1, %v41_v0 }
   0x3   :  { %29 = vst.msk [vmem:[#allocation2] sm:$0x3f] %vm28_vm0, %v1968_v1 }
   0x4   :  { %12 = vsyncpa [#allocation5], 0  ;;  %31 = vst.msk [vmem:[#allocation2 + $0x10] sm:$0x3f] %vm28_vm0, %v1968_v1  ;;  %s1969_s26 = smov 64   ;;  %v1863_v40 = vld [vmem:[%s2671_s1 + $0x38] sm:$0xff] }
   0x5   :  { %32 = vst.msk [vmem:[#allocation2 + $0x18] sm:$0x3f] %vm28_vm0, %v1968_v1  ;;  %v42_v3 = vld [vmem:[%s2670_s0 + $0x4] sm:$0xf]  ;;  %v43_v4 = vld [vmem:[%s2670_s0 + $0x8] sm:$0xf]  ;;  %679 = vmatpush.bf16.msra.mxu0 %v1863_v40 }
   0x6   :  { %33 = vst.msk [vmem:[#allocation2 + $0x20] sm:$0x3f] %vm28_vm0, %v1968_v1  ;;  %v44_v5 = vld [vmem:[%s2670_s0 + $0xc] sm:$0xf]  ;;  %v45_v6 = vld [vmem:[%s2670_s0 + $0x10] sm:$0xf] }
   0x7   :  { %34 = vst.msk [vmem:[#allocation2 + $0x28] sm:$0x3f] %vm28_vm0, %v1968_v1  ;;  %v48_v7 = vld [vmem:[%s2670_s0 + $0x1c] sm:$0xf]  ;;  %v47_v8 = vld [vmem:[%s2670_s0 + $0x18] sm:$0xf] }
   0x8   :  { %35 = vst.msk [vmem:[#allocation2 + $0x30] sm:$0x3f] %vm28_vm0, %v1968_v1  ;;  %v46_v9 = vld [vmem:[%s2670_s0 + $0x14] sm:$0xf]  ;;  %v1871_v41 = vld [vmem:[%s2671_s1 + $0x78] sm:$0xff]  ;;  %v1861_v45 = vld [vmem:[%s2671_s1 + $0x28] sm:$0xff] }
   0x9   :  { %v2022_v2 = vld [vmem:[#allocation2 + $0x8] sm:$0x3f]  ;;  %36 = vst.msk [vmem:[#allocation2 + $0x38] sm:$0x3f] %vm28_vm0, %v1968_v1  ;;  %698 = vmatpush.bf16.msra.mxu1 %v1871_v41  ;;  %v1869_v46 = vld [vmem:[%s2671_s1 + $0x68] sm:$0xff]  ;;  %v1860_v48 = vld [vmem:[%s2671_s1 + $0x20] sm:$0xff] }
   0xa   :  { %132 = vrot.lane.b32.xlu1 %v2022_v2, %s1969_s26  ;;  %37 = vst.msk [vmem:[#allocation2 + $0x40] sm:$0x3f] %vm28_vm0, %v1968_v1  ;;  %v83_v14 = vrot.slane %v2022_v2, 1  ;;  %v2095_v17 = vld [vmem:[#allocation2] sm:$0x3f]  ;;  %v115_v19 = vrot.slane %v2022_v2, 2 }
   0xb   :  { %38 = vst.msk [vmem:[#allocation2 + $0x48] sm:$0x3f] %vm28_vm0, %v1968_v1  ;;  %v82_v20 = vrot.slane %v2095_v17, 1  ;;  %v1862_v43 = vld [vmem:[%s2671_s1 + $0x30] sm:$0xff]  ;;  %v1868_v49 = vld [vmem:[%s2671_s1 + $0x60] sm:$0xff]  ;;  %v1859_v50 = vld [vmem:[%s2671_s1 + $0x18] sm:$0xff] }
   0xc   :  { %39 = vst.msk [vmem:[#allocation2 + $0x50] sm:$0x3f] %vm28_vm0, %v1968_v1  ;;  %v1870_v44 = vld [vmem:[%s2671_s1 + $0x70] sm:$0xff]  ;;  %680 = vmatpush.bf16.msra.mxu0 %v1862_v43  ;;  %v1867_v51 = vld [vmem:[%s2671_s1 + $0x58] sm:$0xff]  ;;  %v1857_v55 = vld [vmem:[%s2671_s1 + $0x8] sm:$0xff]  ;;  %vm210_vm2 = vcmask 523264  }
   0xd   :  { %40 = vst.msk [vmem:[#allocation2 + $0x58] sm:$0x3f] %vm28_vm0, %v1968_v1  ;;  %699 = vmatpush.bf16.msra.mxu1 %v1870_v44  ;;  %v1858_v53 = vld [vmem:[%s2671_s1 + $0x10] sm:$0xff]  ;;  %v1865_v56 = vld [vmem:[%s2671_s1 + $0x48] sm:$0xff]  ;;  %v1856_v59 = vld [vmem:[%s2671_s1] sm:$0xff]  ;;  %vm283_vm3 = vcmask 1043456  }
   0xe   :  { %790 = vst.msk [vmem:[#allocation3] sm:$0xf] %vm50_vm1, %v1968_v1  ;;  %v2126_v27 = vld [vmem:[#allocation2 + $0x28] sm:$0x3f]  ;;  %v1864_v60 = vld [vmem:[%s2671_s1 + $0x40] sm:$0xff]  ;;  %v114_v41 = vrot.slane %v2095_v17, 2 }
   0xf   :  { %791 = vst.msk [vmem:[#allocation3 + $0x4] sm:$0xf] %vm50_vm1, %v1968_v1  ;;  %v2117_v23 = vld [vmem:[#allocation2 + $0x30] sm:$0x3f]  ;;  %v194_v28 = vrot.slane %v2126_v27, 1  ;;  %v1866_v54 = vld [vmem:[%s2671_s1 + $0x50] sm:$0xff] }
  0x10   :  { %792 = vst.msk [vmem:[#allocation3 + $0x8] sm:$0xf] %vm50_vm1, %v1968_v1  ;;  %v86_v25 = vrot.slane %v2117_v23, 1  ;;  %681 = vmatpush.bf16.msra.mxu0 %v1861_v45  ;;  %v1878_v45 = vld [vmem:[%s2671_s1 + $0xb0] sm:$0xff]  ;;  %vm817_vm4 = vcmask 516096   ;;  %vm820_vm5 = vcmask 518146  }
  0x11   :  { %793 = vst.msk [vmem:[#allocation3 + $0xc] sm:$0xf] %vm50_vm1, %v1968_v1  ;;  %700 = vmatpush.bf16.msra.mxu1 %v1869_v46  ;;  %v118_v46 = vrot.slane %v2117_v23, 2  ;;  %vm978_vm6 = vcmask 1041408   ;;  %vm980_vm7 = vcmask 1045508   ;;  %vm1437_vm8 = vcmask 1041409  }
  0x12   :  { %794 = vst.msk [vmem:[#allocation3 + $0x10] sm:$0xf] %vm50_vm1, %v1968_v1  ;;  %s1970_s8 = smov [#allocation4]   ;;  %s1510_s12 = sshll.u32 %s2677_s7, 4  ;;  %s1511_s12 = int_to_ptr.hbm [resolvable:$true] %s1510_s12 }
  0x13   :  { %795 = vst.msk [vmem:[#allocation3 + $0x14] sm:$0xf] %vm50_vm1, %v1968_v1  ;;  %s1508_s9 = sshll.u32 %s1970_s8, 4  ;;  %s1509_s9 = int_to_ptr.vmem [resolvable:$true] %s1508_s9 }
  0x14   :  { %796 = vst.msk [vmem:[#allocation3 + $0x18] sm:$0xf] %vm50_vm1, %v1968_v1  ;;  %v2155_v34 = vld [vmem:[#allocation2 + $0x58] sm:$0x3f]  ;;  %682 = vmatpush.bf16.msra.mxu0 %v1860_v48  ;;  %v1877_v48 = vld [vmem:[%s2671_s1 + $0xa8] sm:$0xff] }
  0x15   :  { %797 = vst.msk [vmem:[#allocation3 + $0x1c] sm:$0xf] %vm50_vm1, %v1968_v1  ;;  %v195_v36 = vrot.slane %v2155_v34, 1  ;;  %701 = vmatpush.bf16.msra.mxu1 %v1868_v49  ;;  %v1885_v49 = vld [vmem:[%s2671_s1 + $0xe8] sm:$0xff] }
  0x16   :  { %54 = vst.msk [vmem:[#allocation2 + $0x11] sm:$0xf] %vm50_vm1, %v42_v3 }
  0x17   :  { %57 = vst.msk [vmem:[#allocation2 + $0x19] sm:$0xf] %vm50_vm1, %v43_v4 }
  0x18   :  { %60 = vst.msk [vmem:[#allocation2 + $0x21] sm:$0xf] %vm50_vm1, %v44_v5  ;;  %683 = vmatpush.bf16.msra.mxu0 %v1859_v50  ;;  %v1891_v50 = vld [vmem:[%s2671_s1 + $0x118] sm:$0xff] }
  0x19   :  { %52 = vst.msk [vmem:[#allocation2 + $0x39] sm:$0xf] %vm50_vm1, %v45_v6  ;;  %702 = vmatpush.bf16.msra.mxu1 %v1867_v51 }
  0x1a   :  { %61 = vst.msk [vmem:[#allocation2 + $0x51] sm:$0xf] %vm50_vm1, %v48_v7 }
  0x1b   :  { %58 = vst.msk [vmem:[#allocation2 + $0x49] sm:$0xf] %vm50_vm1, %v47_v8 }
  0x1c   :  { %55 = vst.msk [vmem:[#allocation2 + $0x41] sm:$0xf] %vm50_vm1, %v46_v9  ;;  %684 = vmatpush.bf16.msra.mxu0 %v1858_v53 }
  0x1d   :  { %v2067_v10 = vld [vmem:[#allocation2 + $0x10] sm:$0x3f]  ;;  %703 = vmatpush.bf16.msra.mxu1 %v1866_v54 }
  0x1e   :  { %v84_v11 = vrot.slane %v2067_v10, 1  ;;  %134 = vrot.lane.b32.xlu1 %v2067_v10, %s1969_s26  ;;  %v2072_v12 = vld [vmem:[#allocation2 + $0x18] sm:$0x3f]  ;;  %v2075_v13 = vrot.slane %v2067_v10, 2 }
  0x1f   :  { %136 = vrot.lane.b32.xlu2 %v2072_v12, %s1969_s26  ;;  %v85_v15 = vrot.slane %v2072_v12, 1  ;;  %v2085_v16 = vld [vmem:[#allocation2 + $0x20] sm:$0x3f]  ;;  %v2142_v31 = vrot.slane %v2072_v12, 2 }
  0x20   :  { %94 = vrot.lane.b32.xlu0 %v84_v11, %s1969_s26  ;;  %308 = vst [vmem:[#allocation1 + $0x20] ss:$2 sm:$0xff] %v2075_v13  ;;  %v2097_v18 = vld [vmem:[#allocation2 + $0x38] sm:$0x3f]  ;;  %v156_v33 = vrot.slane %v2085_v16, 1  ;;  %v166_v37 = vrot.slane %v2085_v16, 2  ;;  %685 = vmatpush.bf16.msra.mxu0 %v1857_v55 }
  0x21   :  { %v2107_v21 = vld [vmem:[#allocation2 + $0x50] sm:$0x3f]  ;;  %v87_v30 = vrot.slane %v2097_v18, 1  ;;  %310 = vst [vmem:[#allocation1 + $0x21] ss:$2 sm:$0xff] %v2142_v31  ;;  %v119_v39 = vrot.slane %v2097_v18, 2  ;;  %704 = vmatpush.bf16.msra.mxu1 %v1865_v56 }
  0x22   :  { %v2121_v26 = vld [vmem:[#allocation2 + $0x48] sm:$0x3f]  ;;  %v157_v32 = vrot.slane %v2107_v21, 1  ;;  %v167_v42 = vrot.slane %v2107_v21, 2 }
  0x23   :  { %v2111_v22 = vld [vmem:[#allocation2 + $0x40] sm:$0x3f]  ;;  %v89_v29 = vrot.slane %v2121_v26, 1  ;;  %v2169_v38 = vrot.slane %v2121_v26, 2 }
  0x24   :  { %v88_v24 = vrot.slane %v2111_v22, 1  ;;  %v2158_v35 = vrot.slane %v2111_v22, 2  ;;  %686 = vmatpush.bf16.msra.mxu0 %v1856_v59 }
  0x25   :  { %705 = vmatpush.bf16.msra.mxu1 %v1864_v60 }
  0x26   :  { %92 = vrot.lane.b32.xlu1 %v83_v14, %s1969_s26 }
  0x27   :  { %138 = vrot.lane.b32.xlu2 %v2085_v16, %s1969_s26 }
  0x28   :  { %96 = vrot.lane.b32.xlu0 %v85_v15, %s1969_s26  ;;  %759 = vmatpush.bf16.msrb.mxu0 %v1891_v50 }
  0x2e   :  { %140 = vrot.lane.b32.xlu1 %v2097_v18, %s1969_s26 }
  0x2f   :  { %168 = vrot.lane.b32.xlu2 %v115_v19, %s1969_s26 }
  0x30   :  { %90 = vrot.lane.b32.xlu0 %v82_v20, %s1969_s26  ;;  %v1879_v20 = vld [vmem:[%s2671_s1 + $0xb8] sm:$0xff] }
  0x31   :  { %717 = vmatpush.bf16.msra.mxu2 %v1879_v20 }
  0x35   :  { %718 = vmatpush.bf16.msra.mxu2 %v1878_v45 }
  0x36   :  { %146 = vrot.lane.b32.xlu1 %v2107_v21, %s1969_s26 }
  0x37   :  { %142 = vrot.lane.b32.xlu2 %v2111_v22, %s1969_s26 }
  0x38   :  { %170 = vrot.lane.b32.xlu0 %v2075_v13, %s1969_s26 }
  0x39   :  { %719 = vmatpush.bf16.msra.mxu2 %v1877_v48  ;;  %v1880_v48 = vld [vmem:[%s2671_s1 + $0xc0] sm:$0xff] }
  0x3e   :  { %102 = vrot.lane.b32.xlu1 %v88_v24, %s1969_s26 }
  0x3f   :  { %98 = vrot.lane.b32.xlu2 %v86_v25, %s1969_s26 }
  0x40   :  { %144 = vrot.lane.b32.xlu0 %v2121_v26, %s1969_s26 }
  0x46   :  { %198 = vrot.lane.b32.xlu1 %v194_v28, %s1969_s26 }
  0x47   :  { %104 = vrot.lane.b32.xlu2 %v89_v29, %s1969_s26 }
  0x48   :  { %100 = vrot.lane.b32.xlu0 %v87_v30, %s1969_s26 }
  0x4e   :  { %200 = vrot.lane.b32.xlu1 %v157_v32, %s1969_s26 }
  0x4f   :  { %172 = vrot.lane.b32.xlu2 %v2142_v31, %s1969_s26 }
  0x50   :  { %196 = vrot.lane.b32.xlu0 %v156_v33, %s1969_s26 }
  0x56   :  { %178 = vrot.lane.b32.xlu1 %v2158_v35, %s1969_s26 }
  0x57   :  { %202 = vrot.lane.b32.xlu2 %v195_v36, %s1969_s26 }
  0x58   :  { %174 = vrot.lane.b32.xlu0 %v166_v37, %s1969_s26 }
  0x5f   :  { %180 = vrot.lane.b32.xlu2 %v2169_v38, %s1969_s26 }
  0x60   :  { %176 = vrot.lane.b32.xlu0 %v119_v39, %s1969_s26 }
  0x68   :  { %182 = vrot.lane.b32.xlu0 %v167_v42, %s1969_s26 }
  0x79   :  { %v137_v47 = vpop.permute.xlu2 %136 }
  0x7a   :  { %v221_v61 = vsel %vm210_vm2, %v2075_v13, %v137_v47 }
  0x7b   :  { %v271_v62 = vrot.slane %v221_v61, 4 }
  0x7c   :  { %v133_v57 = vpop.permute.xlu1 %132 }
  0x7d   :  { %v219_v47 = vsel %vm210_vm2, %v114_v41, %v133_v57  ;;  %v208_v41 = vrot.slane %v2126_v27, 2 }
  0x7e   :  { %v267_v54 = vrot.slane %v219_v47, 4  ;;  %v1872_v47 = vld [vmem:[%s2671_s1 + $0x80] sm:$0xff] }
  0x81   :  { %v139_v52 = vpop.permute.xlu2 %138 }
  0x82   :  { %v222_v8 = vsel %vm210_vm2, %v2142_v31, %v139_v52 }
  0x89   :  { %v169_v58 = vpop.permute.xlu2 %168 }
  0x8a   :  { %v227_v4 = vsel %vm210_vm2, %v83_v14, %v169_v58  ;;  %v1887_v14 = vld [vmem:[%s2671_s1 + $0xf8] sm:$0xff]  ;;  %v2280_v58 = vld.sshfl [vmem:[#allocation1 + $0x20] sm:$0xff pattern:$0x75316420] }
  0x8b   :  { %736 = vmatpush.bf16.msra.mxu3 %v1887_v14 }
  0x90   :  { %v135_v63 = vpop.permute.xlu1 %134 }
  0x91   :  { %v2231_v0 = vpop.permute.xlu2 %142  ;;  %v220_v5 = vsel %vm210_vm2, %v115_v19, %v135_v63  ;;  %v273_v19 = vrot.slane %v222_v8, 4  ;;  %v1875_v63 = vld [vmem:[%s2671_s1 + $0x98] sm:$0xff] }
  0x92   :  { %v95_v1 = vpop.permute.xlu0 %94  ;;  %v269_v13 = vrot.slane %v220_v5, 4  ;;  %v224_v50 = vsel %vm210_vm2, %v119_v39, %v2231_v0 }
  0x93   :  { %v213_v3 = vsel %vm210_vm2, %v2067_v10, %v95_v1  ;;  %v1883_v1 = vld [vmem:[%s2671_s1 + $0xd8] sm:$0xff]  ;;  %v1882_v10 = vld [vmem:[%s2671_s1 + $0xd0] sm:$0xff] }
  0x94   :  { %v268_v6 = vrot.slane %v213_v3, 4  ;;  %v288_v7 = vsel %vm283_vm3, %v213_v3, %v271_v62  ;;  %v1884_v62 = vld [vmem:[%s2671_s1 + $0xe0] sm:$0xff]  ;;  %v1890_v3 = vld [vmem:[%s2671_s1 + $0x110] sm:$0xff] }
  0x95   :  { %312 = vst [vmem:[#allocation1 + $0x30] ss:$2 sm:$0xff] %v288_v7  ;;  %760 = vmatpush.bf16.msrb.mxu0 %v1890_v3 }
  0x96   :  { %v285_v9 = vsel %vm283_vm3, %v227_v4, %v268_v6 }
  0x97   :  { %304 = vst [vmem:[#allocation1 + $0x10] ss:$2 sm:$0xff] %v285_v9 }
  0x98   :  { %v93_v25 = vpop.permute.xlu1 %92 }
  0x99   :  { %v212_v28 = vsel %vm210_vm2, %v2022_v2, %v93_v25  ;;  %v99_v31 = vpop.permute.xlu2 %98  ;;  %v1886_v2 = vld [vmem:[%s2671_s1 + $0xf0] sm:$0xff] }
  0x9a   :  { %v97_v36 = vpop.permute.xlu0 %96  ;;  %v286_v40 = vsel %vm283_vm3, %v212_v28, %v269_v13  ;;  %737 = vmatpush.bf16.msra.mxu3 %v1886_v2  ;;  %v215_v53 = vsel %vm210_vm2, %v2117_v23, %v99_v31  ;;  %v1876_v23 = vld [vmem:[%s2671_s1 + $0xa0] sm:$0xff]  ;;  %v1874_v28 = vld [vmem:[%s2671_s1 + $0x90] sm:$0xff] }
  0x9b   :  { %v214_v43 = vsel %vm210_vm2, %v2072_v12, %v97_v36  ;;  %302 = vst [vmem:[#allocation1 + $0x1] ss:$2 sm:$0xff] %v286_v40  ;;  %720 = vmatpush.bf16.msra.mxu2 %v1876_v23  ;;  %v1873_v36 = vld [vmem:[%s2671_s1 + $0x88] sm:$0xff] }
  0x9c   :  { %v290_v44 = vsel %vm283_vm3, %v214_v43, %v273_v19  ;;  %v270_v4 = vrot.slane %v214_v43, 4  ;;  %v1881_v40 = vld [vmem:[%s2671_s1 + $0xc8] sm:$0xff] }
  0x9d   :  { %314 = vst [vmem:[#allocation1 + $0x31] ss:$2 sm:$0xff] %v290_v44 }
  0x9e   :  { %738 = vmatpush.bf16.msra.mxu3 %v1885_v49  ;;  %v1888_v49 = vld [vmem:[%s2671_s1 + $0x100] sm:$0xff] }
  0x9f   :  { %721 = vmatpush.bf16.msra.mxu2 %v1875_v63 }
  0xa0   :  { %v141_v51 = vpop.permute.xlu1 %140 }
  0xa1   :  { %v223_v52 = vsel %vm210_vm2, %v118_v46, %v141_v51  ;;  %v105_v59 = vpop.permute.xlu2 %104 }
  0xa2   :  { %v91_v55 = vpop.permute.xlu0 %90  ;;  %v275_v56 = vrot.slane %v223_v52, 4  ;;  %739 = vmatpush.bf16.msra.mxu3 %v1884_v62 }
  0xa3   :  { %v211_v57 = vsel %vm210_vm2, %v2095_v17, %v91_v55  ;;  %722 = vmatpush.bf16.msra.mxu2 %v1874_v28  ;;  %v277_v55 = vrot.slane %v224_v50, 4 }
  0xa4   :  { %v284_v60 = vsel %vm283_vm3, %v211_v57, %v267_v54  ;;  %v292_v61 = vsel %vm283_vm3, %v215_v53, %v275_v56  ;;  %v320_v7 = vld.sshfl [vmem:[#allocation1 + $0x30] sm:$0xff pattern:$0x75316420]  ;;  %v321_v8 = vld.sshfl [vmem:[#allocation1 + $0x38] sm:$0xff pattern:$0x75316420]  ;;  %v218_v54 = vsel %vm210_vm2, %v2121_v26, %v105_v59 }
  0xa5   :  { %300 = vst [vmem:[#allocation1] ss:$2 sm:$0xff] %v284_v60  ;;  %v278_v28 = vrot.slane %v218_v54, 4 }
  0xa6   :  { %326 = vst [vmem:[#allocation1 + $0x20] ss:$2 sm:$0xff] %v292_v61  ;;  %740 = vmatpush.bf16.msra.mxu3 %v1883_v1 }
  0xa7   :  { %723 = vmatpush.bf16.msra.mxu2 %v1873_v36 }
  0xa8   :  { %v147_v17 = vpop.permute.xlu1 %146 }
  0xa9   :  { %v173_v9 = vpop.permute.xlu2 %172  ;;  %v226_v2 = vsel %vm210_vm2, %v2169_v38, %v147_v17 }
  0xaa   :  { %v171_v5 = vpop.permute.xlu0 %170  ;;  %741 = vmatpush.bf16.msra.mxu3 %v1882_v10  ;;  %v281_v51 = vrot.slane %v226_v2, 4 }
  0xab   :  { %v228_v6 = vsel %vm210_vm2, %v84_v11, %v171_v5  ;;  %v1889_v11 = vld [vmem:[%s2671_s1 + $0x108] sm:$0xff]  ;;  %724 = vmatpush.bf16.msra.mxu2 %v1872_v47  ;;  %v229_v5 = vsel %vm210_vm2, %v85_v15, %v173_v9 }
  0xac   :  { %v287_v13 = vsel %vm283_vm3, %v228_v6, %v270_v4  ;;  %v315_v20 = vld.sshfl [vmem:[#allocation1] sm:$0xff pattern:$0x75316420]  ;;  %v316_v14 = vld.sshfl [vmem:[#allocation1 + $0x8] sm:$0xff pattern:$0x75316420]  ;;  %761 = vmatpush.bf16.msrb.mxu0 %v1889_v11  ;;  %v298_v0 = vsel %vm283_vm3, %v218_v54, %v281_v51 }
  0xad   :  { %306 = vst [vmem:[#allocation1 + $0x11] ss:$2 sm:$0xff] %v287_v13  ;;  %v371_v19 = vpack.c.bf16 %v320_v7, %v315_v20  ;;  %v372_v25 = vpack.c.bf16 %v321_v8, %v316_v14  ;;  %v2396_v54 = vld [vmem:[#allocation3 + $0xc] sm:$0xf] }
  0xae   :  { %742 = vmatpush.bf16.msra.mxu3 %v1881_v40 }
  0xaf   :  { %687 = vmatmul.bf16.vlgmr.msra.gmra.mxu0 %v371_v19  ;;  %706 = vmatmul.bf16.vlgmr.msra.gmra.mxu1 %v372_v25 }
  0xb0   :  { %v103_v31 = vpop.permute.xlu1 %102  ;;  %762 = vmatpush.bf16.msrb.mxu0 %v1888_v49 }
  0xb1   :  { %v2325_v46 = vpop.permute.xlu2 %202 }
  0xb2   :  { %v145_v43 = vpop.permute.xlu0 %144  ;;  %743 = vmatpush.bf16.msra.mxu3 %v1880_v48  ;;  %v238_v47 = vsel %vm210_vm2, %v2155_v34, %v2325_v46 }
  0xb3   :  { %v225_v52 = vsel %vm210_vm2, %v2158_v35, %v145_v43 }
  0xb4   :  { %v2319_v44 = vld.sshfl [vmem:[#allocation1 + $0x10] sm:$0xff pattern:$0x75316420]  ;;  %v2321_v45 = vld.sshfl [vmem:[#allocation1 + $0x18] sm:$0xff pattern:$0x75316420] }
  0xb5   :  { %325 = vst [vmem:[#allocation1 + $0x11] ss:$2 sm:$0xff] %v208_v41  ;;  %v279_v57 = vrot.slane %v225_v52, 4 }
  0xb6   :  { %324 = vst [vmem:[#allocation1 + $0x10] ss:$2 sm:$0xff] %v166_v37  ;;  %v217_v37 = vsel %vm210_vm2, %v2111_v22, %v103_v31 }
  0xb7   :  { %v296_v61 = vsel %vm283_vm3, %v217_v37, %v279_v57  ;;  %v276_v36 = vrot.slane %v217_v37, 4  ;;  %v1939_v57 = vld [vmem:[%s2672_s2] ss:$0 sm:$0xff] }
  0xb8   :  { %v199_v53 = vpop.permute.xlu1 %198 }
  0xb9   :  { %v181_v59 = vpop.permute.xlu2 %180  ;;  %v236_v8 = vsel %vm210_vm2, %v2126_v27, %v199_v53 }
  0xba   :  { %v101_v56 = vpop.permute.xlu0 %100  ;;  %v233_v3 = vsel %vm210_vm2, %v89_v29, %v181_v59  ;;  %v274_v10 = vrot.slane %v236_v8, 4 }
  0xbb   :  { %v216_v39 = vsel %vm210_vm2, %v2097_v18, %v101_v56  ;;  %v282_v18 = vrot.slane %v238_v47, 4 }
  0xbc   :  { %v294_v60 = vsel %vm283_vm3, %v216_v39, %v277_v55  ;;  %v918_v55 = vrot.slane %v2396_v54, 1 }
  0xbd   :  { %v332_v23 = vld.sshfl [vmem:[#allocation1 + $0x10] sm:$0xff pattern:$0x75316420]  ;;  %327 = vst [vmem:[#allocation1 + $0x21] ss:$2 sm:$0xff] %v294_v60 }
  0xbe   :  { %339 = vst [vmem:[#allocation1 + $0x10] ss:$2 sm:$0xff] %v296_v61  ;;  %922 = vrot.lane.b32.xlu1 %v918_v55, %s1969_s26  ;;  %v2408_v60 = vld [vmem:[#allocation3 + $0x1c] sm:$0xf] }
  0xbf   :  { %340 = vst [vmem:[#allocation1 + $0x11] ss:$2 sm:$0xff] %v298_v0  ;;  %v932_v0 = vrot.slane %v2396_v54, 2 }
  0xc0   :  { %v201_v62 = vpop.permute.xlu1 %200 }
  0xc1   :  { %v237_v17 = vsel %vm210_vm2, %v2107_v21, %v201_v62 }
  0xc2   :  { %v197_v63 = vpop.permute.xlu0 %196  ;;  %v280_v1 = vrot.slane %v237_v17, 4 }
  0xc3   :  { %v235_v4 = vsel %vm210_vm2, %v2085_v16, %v197_v63 }
  0xc4   :  { %v272_v6 = vrot.slane %v235_v4, 4  ;;  %v333_v7 = vld.sshfl [vmem:[#allocation1 + $0x20] sm:$0xff pattern:$0x75316420]  ;;  %v297_v20 = vsel %vm283_vm3, %v233_v3, %v280_v1 }
  0xc5   :  { %v334_v13 = vld.sshfl [vmem:[#allocation1 + $0x28] sm:$0xff pattern:$0x75316420] }
  0xc6   :  { %v289_v14 = vsel %vm283_vm3, %v229_v5, %v272_v6  ;;  %v346_v26 = vld.sshfl [vmem:[#allocation1 + $0x10] sm:$0xff pattern:$0x75316420]  ;;  %v347_v19 = vld.sshfl [vmem:[#allocation1 + $0x18] sm:$0xff pattern:$0x75316420] }
  0xc7   :  { %322 = vst [vmem:[#allocation1] ss:$2 sm:$0xff] %v289_v14  ;;  %v376_v29 = vpack.c.bf16 %v346_v26, %v333_v7  ;;  %v377_v25 = vpack.c.bf16 %v347_v19, %v334_v13 }
  0xc8   :  { %v179_v12 = vpop.permute.xlu1 %178  ;;  %341 = vst [vmem:[#allocation1 + $0x20] ss:$2 sm:$0xff] %v297_v20 }
  0xc9   :  { %692 = vmatmul.bf16.gmra.mxu0 %v376_v29  ;;  %711 = vmatmul.bf16.gmra.mxu1 %v377_v25  ;;  %v232_v15 = vsel %vm210_vm2, %v88_v24, %v179_v12  ;;  %v933_v25 = vrot.slane %v2408_v60, 2 }
  0xca   :  { %v175_v27 = vpop.permute.xlu0 %174  ;;  %v295_v9 = vsel %vm283_vm3, %v232_v15, %v278_v28 }
  0xcb   :  { %v230_v11 = vsel %vm210_vm2, %v156_v33, %v175_v27  ;;  %329 = vst [vmem:[#allocation1 + $0x31] ss:$2 sm:$0xff] %v295_v9  ;;  %v375_v33 = vpack.c.bf16 %v332_v23, %v2280_v58  ;;  %v919_v23 = vrot.slane %v2408_v60, 1 }
  0xcc   :  { %v291_v31 = vsel %vm283_vm3, %v230_v11, %v274_v10 }
  0xcd   :  { %323 = vst [vmem:[#allocation1 + $0x1] ss:$2 sm:$0xff] %v291_v31  ;;  %926 = vrot.lane.b32.xlu0 %v919_v23, %s1969_s26 }
  0xd2   :  { %v177_v40 = vpop.permute.xlu0 %176 }
  0xd3   :  { %v231_v41 = vsel %vm210_vm2, %v87_v30, %v177_v40 }
  0xd4   :  { %v293_v22 = vsel %vm283_vm3, %v231_v41, %v276_v36  ;;  %v330_v24 = vld.sshfl [vmem:[#allocation1] sm:$0xff pattern:$0x75316420]  ;;  %v331_v43 = vld.sshfl [vmem:[#allocation1 + $0x8] sm:$0xff pattern:$0x75316420] }
  0xd5   :  { %328 = vst [vmem:[#allocation1 + $0x30] ss:$2 sm:$0xff] %v293_v22  ;;  %v373_v2 = vpack.c.bf16 %v330_v24, %v2319_v44  ;;  %v374_v16 = vpack.c.bf16 %v331_v43, %v2321_v45  ;;  %v209_v44 = vrot.slane %v2155_v34, 2 }
  0xd6   :  { %337 = vst [vmem:[#allocation1] ss:$2 sm:$0xff] %v2158_v35 }
  0xd7   :  { %725 = vmatmul.bf16.vlgmr.msra.gmra.mxu2 %v373_v2  ;;  %338 = vst [vmem:[#allocation1 + $0x1] ss:$2 sm:$0xff] %v2169_v38  ;;  %744 = vmatmul.bf16.vlgmr.msra.gmra.mxu3 %v374_v16 }
  0xd9   :  { %1663 = vmatmul.msk.bf16.vlgmr.msrb.gmra.mxu0 %vm210_vm2, %v375_v33 }
  0xda   :  { %v183_v30 = vpop.permute.xlu0 %182 }
  0xdb   :  { %v234_v58 = vsel %vm210_vm2, %v157_v32, %v183_v30 }
  0xdc   :  { %v299_v35 = vsel %vm283_vm3, %v234_v58, %v282_v18  ;;  %v335_v45 = vld.sshfl [vmem:[#allocation1 + $0x30] sm:$0xff pattern:$0x75316420]  ;;  %v336_v48 = vld.sshfl [vmem:[#allocation1 + $0x38] sm:$0xff pattern:$0x75316420] }
  0xdd   :  { %342 = vst [vmem:[#allocation1 + $0x21] ss:$2 sm:$0xff] %v299_v35 }
  0xde   :  { %343 = vst [vmem:[#allocation1 + $0x30] ss:$2 sm:$0xff] %v167_v42  ;;  %v345_v38 = vld.sshfl [vmem:[#allocation1] sm:$0xff pattern:$0x75316420] }
  0xdf   :  { %344 = vst [vmem:[#allocation1 + $0x31] ss:$2 sm:$0xff] %v209_v44  ;;  %v2400_v42 = vld [vmem:[#allocation3] sm:$0xf] }
  0xe0   :  { %v858_v37 = vrot.slane %v2400_v42, 1 }
  0xe2   :  { %862 = vrot.lane.b32.xlu1 %v858_v37, %s1969_s26 }
  0xe4   :  { %v348_v46 = vld.sshfl [vmem:[#allocation1 + $0x20] sm:$0xff pattern:$0x75316420]  ;;  %v349_v49 = vld.sshfl [vmem:[#allocation1 + $0x28] sm:$0xff pattern:$0x75316420] }
  0xe5   :  { %v378_v50 = vpack.c.bf16 %v348_v46, %v335_v45  ;;  %v379_v51 = vpack.c.bf16 %v349_v49, %v336_v48 }
  0xe6   :  { %v350_v52 = vld.sshfl [vmem:[#allocation1 + $0x30] sm:$0xff pattern:$0x75316420] }
  0xe7   :  { %730 = vmatmul.bf16.gmra.mxu2 %v378_v50  ;;  %749 = vmatmul.bf16.gmra.mxu3 %v379_v51  ;;  %v380_v34 = vpack.c.bf16 %v350_v52, %v345_v38  ;;  %1002 = vst [vmem:[#allocation1 + $0x21] ss:$4 sm:$0xff] %v932_v0 }
  0xe8   :  { %1006 = vst [vmem:[#allocation1 + $0x23] ss:$4 sm:$0xff] %v933_v25  ;;  %v1907_v25 = vld [vmem:[%s2673_s3 + $0x78] sm:$0xff] }
  0xe9   :  { %1664 = vmatmul.msk.bf16.gmra.mxu0 %vm210_vm2, %v380_v34  ;;  %1330 = vmatpush.bf16.msrb.mxu2 %v1907_v25 }
 0x12c   :  { %v688_v32 = vpop.f32.mrf.mxu0  ;;  %v707_v39 = vpop.f32.mrf.mxu1 }
 0x12d   :  { %v689_v61 = vadd.f32 %v1939_v57, %v688_v32 }
 0x12f   :  { %v708_v62 = vadd.f32 %v707_v39, %v689_v61 }
 0x134   :  { %v690_v53 = vpop.f32.mrf.mxu0  ;;  %v709_v5 = vpop.f32.mrf.mxu1 }
 0x135   :  { %v691_v3 = vadd.f32 %v1939_v57, %v690_v53 }
 0x137   :  { %v710_v7 = vadd.f32 %v709_v5, %v691_v3 }
 0x146   :  { %v693_v21 = vpop.f32.mrf.mxu0  ;;  %v712_v15 = vpop.f32.mrf.mxu1 }
 0x147   :  { %v694_v28 = vadd.f32 %v1939_v57, %v693_v21 }
 0x149   :  { %v713_v31 = vadd.f32 %v712_v15, %v694_v28  ;;  %v1915_v28 = vld [vmem:[%s2673_s3 + $0xb8] sm:$0xff]  ;;  %v1898_v15 = vld [vmem:[%s2673_s3 + $0x30] sm:$0xff] }
 0x14a   :  { %1343 = vmatpush.bf16.msrb.mxu3 %v1915_v28 }
 0x14e   :  { %v695_v56 = vpop.f32.mrf.mxu0  ;;  %v714_v35 = vpop.f32.mrf.mxu1 }
 0x14f   :  { %v696_v33 = vadd.f32 %v1939_v57, %v695_v56 }
 0x151   :  { %v715_v45 = vadd.f32 %v714_v35, %v696_v33  ;;  %v1920_v33 = vld [vmem:[%s2673_s3 + $0xe0] sm:$0xff]  ;;  %v2531_v35 = vpop.permute.xlu0 %926 }
 0x156   :  { %v764_v59 = vpop.f32.mrf.mxu0 }
 0x15a   :  { %v726_v17 = vpop.f32.mrf.mxu2  ;;  %v745_v63 = vpop.f32.mrf.mxu3 }
 0x15b   :  { %v727_v1 = vadd.f32 %v726_v17, %v708_v62 }
 0x15d   :  { %v746_v4 = vadd.f32 %v745_v63, %v727_v1 }
 0x15e   :  { %v766_v13 = vpop.f32.mrf.mxu0 }
 0x15f   :  { %v765_v6 = vadd.f32 %v764_v59, %v746_v4 }
 0x161   :  { %v774_v8 = vmax.f32 %v765_v6, 0.0 }
 0x162   :  { %v728_v20 = vpop.f32.mrf.mxu2  ;;  %v747_v14 = vpop.f32.mrf.mxu3 }
 0x163   :  { %v782_v26 = vrot.slane %v774_v8, 4  ;;  %v1665_v19 = vrot.slane %v774_v8, 9  ;;  %v729_v29 = vadd.f32 %v728_v20, %v710_v7 }
 0x165   :  { %v1667_v10 = vrot.slane %v782_v26, 9  ;;  %v748_v12 = vadd.f32 %v747_v14, %v729_v29  ;;  %v804_v27 = vmax.f32 %v774_v8, %v1665_v19  ;;  %v1899_v29 = vld [vmem:[%s2673_s3 + $0x38] sm:$0xff] }
 0x166   :  { %v769_v16 = vpop.f32.mrf.mxu0  ;;  %1317 = vmatpush.bf16.msrb.mxu1 %v1899_v29 }
 0x167   :  { %v812_v9 = vmax.f32 %v782_v26, %v1667_v10  ;;  %v767_v11 = vadd.f32 %v766_v13, %v748_v12  ;;  %v2453_v13 = vld [vmem:[#allocation3 + $0x10] sm:$0xf] }
 0x168   :  { %v860_v20 = vrot.slane %v2453_v13, 1  ;;  %v1923_v10 = vld [vmem:[%s2673_s3 + $0xf8] sm:$0xff] }
 0x169   :  { %v814_v36 = vmax.f32 %v804_v27, %v812_v9  ;;  %v775_v40 = vmax.f32 %v767_v11, 0.0  ;;  %1356 = vmatpush.bf16.msra.mxu0 %v1923_v10  ;;  %v1906_v27 = vld [vmem:[%s2673_s3 + $0x70] sm:$0xff]  ;;  %v923_v11 = vpop.permute.xlu1 %922 }
 0x16a   :  { %v731_v41 = vpop.f32.mrf.mxu2  ;;  %v750_v22 = vpop.f32.mrf.mxu3  ;;  %v1914_v9 = vld [vmem:[%s2673_s3 + $0xb0] sm:$0xff]  ;;  %1318 = vmatpush.bf16.msrb.mxu1 %v1898_v15  ;;  %1331 = vmatpush.bf16.msrb.mxu2 %v1906_v27 }
 0x16b   :  { %818 = vst.msk [vmem:[#allocation3 + $0x5] sm:$0x1] %vm817_vm4, %v814_v36  ;;  %v783_v24 = vrot.slane %v775_v40, 4  ;;  %v1669_v43 = vrot.slane %v775_v40, 9  ;;  %v732_v2 = vadd.f32 %v731_v41, %v713_v31  ;;  %v1922_v31 = vld [vmem:[%s2673_s3 + $0xf0] sm:$0xff]  ;;  %1344 = vmatpush.bf16.msrb.mxu3 %v1914_v9  ;;  %v1913_v41 = vld [vmem:[%s2673_s3 + $0xa8] sm:$0xff] }
 0x16c   :  { %821 = vst.msk [vmem:[#allocation3 + $0x4] sm:$0x4] %vm820_vm5, %v814_v36  ;;  %v1897_v36 = vld [vmem:[%s2673_s3 + $0x28] sm:$0xff]  ;;  %v1926_v27 = vld [vmem:[%s2673_s3 + $0x110] sm:$0xff] }
 0x16d   :  { %v1671_v47 = vrot.slane %v783_v24, 9  ;;  %v751_v18 = vadd.f32 %v750_v22, %v732_v2  ;;  %v829_v30 = vmax.f32 %v775_v40, %v1669_v43  ;;  %1357 = vmatpush.bf16.msra.mxu0 %v1922_v31  ;;  %v1905_v40 = vld [vmem:[%s2673_s3 + $0x68] sm:$0xff]  ;;  %v1896_v43 = vld [vmem:[%s2673_s3 + $0x20] sm:$0xff] }
 0x16e   :  { %v771_v21 = vpop.f32.mrf.mxu0  ;;  %v1921_v22 = vld [vmem:[%s2673_s3 + $0xe8] sm:$0xff]  ;;  %1319 = vmatpush.bf16.msrb.mxu1 %v1897_v36  ;;  %1332 = vmatpush.bf16.msrb.mxu2 %v1905_v40  ;;  %v1904_v2 = vld [vmem:[%s2673_s3 + $0x60] sm:$0xff] }
 0x16f   :  { %v837_v44 = vmax.f32 %v783_v24, %v1671_v47  ;;  %v770_v58 = vadd.f32 %v769_v16, %v751_v18  ;;  %1345 = vmatpush.bf16.msrb.mxu3 %v1913_v41  ;;  %v1912_v16 = vld [vmem:[%s2673_s3 + $0xa0] sm:$0xff]  ;;  %v1895_v47 = vld [vmem:[%s2673_s3 + $0x18] sm:$0xff] }
 0x170   :  { %v1903_v18 = vld [vmem:[%s2673_s3 + $0x58] sm:$0xff] }
 0x171   :  { %v839_v48 = vmax.f32 %v829_v30, %v837_v44  ;;  %v776_v38 = vmax.f32 %v770_v58, 0.0  ;;  %1358 = vmatpush.bf16.msra.mxu0 %v1921_v22  ;;  %v863_v30 = vpop.permute.xlu1 %862  ;;  %v1911_v44 = vld [vmem:[%s2673_s3 + $0x98] sm:$0xff]  ;;  %v876_v22 = vrot.slane %v2453_v13, 2 }
 0x172   :  { %v733_v46 = vpop.f32.mrf.mxu2  ;;  %v752_v34 = vpop.f32.mrf.mxu3  ;;  %1320 = vmatpush.bf16.msrb.mxu1 %v1896_v43  ;;  %1333 = vmatpush.bf16.msrb.mxu2 %v1904_v2  ;;  %v1919_v58 = vld [vmem:[%s2673_s3 + $0xd8] sm:$0xff]  ;;  %v934_v10 = vsel %vm210_vm2, %v2400_v42, %v863_v30  ;;  %v949_v2 = vsel %vm210_vm2, %v2408_v60, %v2531_v35 }
 0x173   :  { %842 = vst.msk [vmem:[#allocation3 + $0x9] sm:$0x1] %vm817_vm4, %v839_v48  ;;  %v784_v49 = vrot.slane %v776_v38, 4  ;;  %v1666_v50 = vrot.slane %v776_v38, 9  ;;  %v734_v51 = vadd.f32 %v733_v46, %v715_v45  ;;  %v2416_v52 = vld [vmem:[#allocation3 + $0x4] sm:$0xf]  ;;  %1346 = vmatpush.bf16.msrb.mxu3 %v1912_v16 }
 0x174   :  { %844 = vst.msk [vmem:[#allocation3 + $0x8] sm:$0x4] %vm820_vm5, %v839_v48  ;;  %884 = vrot.lane.b32.xlu1 %v2416_v52, %s1969_s26  ;;  %v875_v32 = vrot.slane %v2416_v52, 2  ;;  %v859_v19 = vrot.slane %v2416_v52, 1  ;;  %v1894_v48 = vld [vmem:[%s2673_s3 + $0x10] sm:$0xff] }
 0x175   :  { %v1668_v53 = vrot.slane %v784_v49, 9  ;;  %v753_v55 = vadd.f32 %v752_v34, %v734_v51  ;;  %v805_v37 = vmax.f32 %v776_v38, %v1666_v50  ;;  %1359 = vmatpush.bf16.msra.mxu0 %v1920_v33  ;;  %v1902_v38 = vld [vmem:[%s2673_s3 + $0x50] sm:$0xff]  ;;  %v1893_v50 = vld [vmem:[%s2673_s3 + $0x8] sm:$0xff] }
 0x176   :  { %904 = vrot.lane.b32.xlu2 %v875_v32, %s1969_s26  ;;  %1321 = vmatpush.bf16.msrb.mxu1 %v1895_v47  ;;  %v1910_v46 = vld [vmem:[%s2673_s3 + $0x90] sm:$0xff]  ;;  %v1901_v51 = vld [vmem:[%s2673_s3 + $0x48] sm:$0xff] }
 0x177   :  { %v813_v56 = vmax.f32 %v784_v49, %v1668_v53  ;;  %v772_v57 = vadd.f32 %v771_v21, %v753_v55  ;;  %1334 = vmatpush.bf16.msrb.mxu2 %v1903_v18  ;;  %1347 = vmatpush.bf16.msrb.mxu3 %v1911_v44  ;;  %v1918_v49 = vld [vmem:[%s2673_s3 + $0xd0] sm:$0xff]  ;;  %v1909_v34 = vld [vmem:[%s2673_s3 + $0x88] sm:$0xff] }
 0x178   :  { %v1917_v55 = vld [vmem:[%s2673_s3 + $0xc8] sm:$0xff] }
 0x179   :  { %v815_v39 = vmax.f32 %v805_v37, %v813_v56  ;;  %v777_v0 = vmax.f32 %v772_v57, 0.0  ;;  %1360 = vmatpush.bf16.msra.mxu0 %v1919_v58  ;;  %v1892_v56 = vld [vmem:[%s2673_s3] sm:$0xff] }
 0x17a   :  { %1322 = vmatpush.bf16.msrb.mxu1 %v1894_v48  ;;  %v1900_v57 = vld [vmem:[%s2673_s3 + $0x40] sm:$0xff] }
 0x17b   :  { %819 = vst.msk [vmem:[#allocation3 + $0x15] sm:$0x1] %vm817_vm4, %v815_v39  ;;  %v785_v61 = vrot.slane %v777_v0, 4  ;;  %v1670_v23 = vrot.slane %v777_v0, 9  ;;  %v2426_v59 = vld [vmem:[#allocation3 + $0x8] sm:$0xf]  ;;  %1335 = vmatpush.bf16.msrb.mxu2 %v1902_v38  ;;  %1348 = vmatpush.bf16.msrb.mxu3 %v1910_v46 }
 0x17c   :  { %822 = vst.msk [vmem:[#allocation3 + $0x14] sm:$0x4] %vm820_vm5, %v815_v39  ;;  %v902_v62 = vrot.slane %v2426_v59, 2  ;;  %v896_v5 = vrot.slane %v2426_v59, 1  ;;  %v874_v39 = vrot.slane %v2400_v42, 2 }
 0x17d   :  { %v1672_v17 = vrot.slane %v785_v61, 9  ;;  %v830_v63 = vmax.f32 %v777_v0, %v1670_v23  ;;  %1361 = vmatpush.bf16.msra.mxu0 %v1918_v49  ;;  %v1908_v0 = vld [vmem:[%s2673_s3 + $0x80] sm:$0xff] }
 0x17e   :  { %906 = vrot.lane.b32.xlu0 %v902_v62, %s1969_s26  ;;  %1000 = vst [vmem:[#allocation1 + $0x20] ss:$4 sm:$0xff] %v902_v62  ;;  %886 = vrot.lane.b32.xlu2 %v2426_v59, %s1969_s26  ;;  %v947_v62 = vsel %vm210_vm2, %v2396_v54, %v923_v11 }
 0x17f   :  { %v838_v1 = vmax.f32 %v785_v61, %v1672_v17  ;;  %1323 = vmatpush.bf16.msrb.mxu1 %v1893_v50  ;;  %1336 = vmatpush.bf16.msrb.mxu2 %v1901_v51  ;;  %v1916_v61 = vld [vmem:[%s2673_s3 + $0xc0] sm:$0xff] }
 0x180   :  { %1349 = vmatpush.bf16.msrb.mxu3 %v1909_v34 }
 0x181   :  { %v840_v3 = vmax.f32 %v830_v63, %v838_v1  ;;  %1362 = vmatpush.bf16.msra.mxu0 %v1917_v55 }
 0x183   :  { %843 = vst.msk [vmem:[#allocation3 + $0x19] sm:$0x1] %vm817_vm4, %v840_v3  ;;  %v2434_v4 = vld [vmem:[#allocation3 + $0x14] sm:$0xf]  ;;  %1324 = vmatpush.bf16.msrb.mxu1 %v1892_v56  ;;  %1337 = vmatpush.bf16.msrb.mxu2 %v1900_v57 }
 0x184   :  { %845 = vst.msk [vmem:[#allocation3 + $0x18] sm:$0x4] %vm820_vm5, %v840_v3  ;;  %v877_v6 = vrot.slane %v2434_v4, 2  ;;  %v861_v26 = vrot.slane %v2434_v4, 1  ;;  %1350 = vmatpush.bf16.msrb.mxu3 %v1908_v0  ;;  %v1935_v0 = vld [vmem:[%s2675_s5 + $0x38] sm:$0xff] }
 0x185   :  { %1363 = vmatpush.bf16.msra.mxu0 %v1916_v61  ;;  %v1934_v61 = vld [vmem:[%s2675_s5 + $0x30] sm:$0xff] }
 0x186   :  { %920 = vrot.lane.b32.xlu0 %v896_v5, %s1969_s26  ;;  %908 = vrot.lane.b32.xlu1 %v877_v6, %s1969_s26 }
 0x187   :  { %1489 = vmatpush.bf16.msra.mxu2 %v1935_v0 }
 0x18b   :  { %v2445_v7 = vld [vmem:[#allocation3 + $0x18] sm:$0xf]  ;;  %1490 = vmatpush.bf16.msra.mxu2 %v1934_v61 }
 0x18c   :  { %v903_v8 = vrot.slane %v2445_v7, 2  ;;  %v897_v14 = vrot.slane %v2445_v7, 1 }
 0x18e   :  { %910 = vrot.lane.b32.xlu2 %v903_v8, %s1969_s26  ;;  %1004 = vst [vmem:[#allocation1 + $0x22] ss:$4 sm:$0xff] %v903_v8  ;;  %888 = vrot.lane.b32.xlu0 %v2434_v4, %s1969_s26 }
 0x18f   :  { %890 = vrot.lane.b32.xlu1 %v2445_v7, %s1969_s26 }
 0x195   :  { %v1011_v57 = vld.sshfl [vmem:[#allocation1 + $0x20] sm:$0xff pattern:$0x73625140] }
 0x196   :  { %924 = vrot.lane.b32.xlu2 %v897_v14, %s1969_s26  ;;  %866 = vrot.lane.b32.xlu0 %v860_v20, %s1969_s26 }
 0x197   :  { %868 = vrot.lane.b32.xlu1 %v861_v26, %s1969_s26 }
 0x19e   :  { %864 = vrot.lane.b32.xlu2 %v859_v19, %s1969_s26 }
 0x1d0   :  { %v2481_v12 = vpop.permute.xlu2 %904 }
 0x1d1   :  { %v942_v3 = vsel %vm210_vm2, %v859_v19, %v2481_v12 }
 0x1d2   :  { %v967_v9 = vrot.slane %v942_v3, 4 }
 0x1d8   :  { %v887_v24 = vpop.permute.xlu2 %886 }
 0x1d9   :  { %v939_v17 = vsel %vm210_vm2, %v875_v32, %v887_v24  ;;  %v1927_v32 = vld [vmem:[%s2673_s3 + $0x118] sm:$0xff]  ;;  %v1924_v24 = vld [vmem:[%s2673_s3 + $0x100] sm:$0xff] }
 0x1da   :  { %v969_v8 = vrot.slane %v939_v17, 6  ;;  %1373 = vmatpush.bf16.msra.mxu1 %v1927_v32  ;;  %v1931_v17 = vld [vmem:[%s2675_s5 + $0x18] sm:$0xff] }
 0x1de   :  { %1374 = vmatpush.bf16.msra.mxu1 %v1926_v27 }
 0x1e6   :  { %v885_v53 = vpop.permute.xlu1 %884 }
 0x1e7   :  { %v938_v63 = vsel %vm210_vm2, %v874_v39, %v885_v53  ;;  %v1021_v39 = vpack.c.bf16 %v1011_v57, %v1011_v57 }
 0x1e8   :  { %v2533_v45 = vpop.permute.xlu2 %910  ;;  %v966_v29 = vrot.slane %v938_v63, 6  ;;  %v1930_v63 = vld [vmem:[%s2675_s5 + $0x10] sm:$0xff] }
 0x1e9   :  { %v945_v43 = vsel %vm210_vm2, %v897_v14, %v2533_v45  ;;  %v977_v14 = vrot.slane %v949_v2, 2 }
 0x1ea   :  { %v979_v31 = vsel %vm978_vm6, %v934_v10, %v966_v29  ;;  %v976_v30 = vrot.slane %v945_v43, 4 }
 0x1ec   :  { %v990_v38 = vsel %vm980_vm7, %v976_v30, %v977_v14 }
 0x1f0   :  { %v925_v21 = vpop.permute.xlu2 %924  ;;  %v907_v37 = vpop.permute.xlu0 %906 }
 0x1f1   :  { %v943_v23 = vsel %vm210_vm2, %v896_v5, %v907_v37  ;;  %v971_v5 = vrot.slane %v947_v62, 2  ;;  %v948_v33 = vsel %vm210_vm2, %v2445_v7, %v925_v21  ;;  %v1932_v62 = vld [vmem:[%s2675_s5 + $0x20] sm:$0xff] }
 0x1f2   :  { %v970_v1 = vrot.slane %v943_v23, 4  ;;  %v974_v58 = vrot.slane %v948_v33, 2  ;;  %v1933_v23 = vld [vmem:[%s2675_s5 + $0x28] sm:$0xff] }
 0x1f3   :  { %1491 = vmatpush.bf16.msra.mxu2 %v1933_v23 }
 0x1f4   :  { %v984_v19 = vsel %vm980_vm7, %v970_v1, %v971_v5  ;;  %v1929_v1 = vld [vmem:[%s2675_s5 + $0x8] sm:$0xff]  ;;  %v1940_v5 = vld [vmem:[%s2674_s4] ss:$0 sm:$0xff] }
 0x1f7   :  { %1492 = vmatpush.bf16.msra.mxu2 %v1932_v62 }
 0x1f8   :  { %v865_v20 = vpop.permute.xlu2 %864  ;;  %v909_v54 = vpop.permute.xlu1 %908 }
 0x1f9   :  { %v935_v25 = vsel %vm210_vm2, %v2416_v52, %v865_v20  ;;  %v921_v28 = vpop.permute.xlu0 %920  ;;  %v944_v16 = vsel %vm210_vm2, %v861_v26, %v909_v54  ;;  %v1928_v20 = vld [vmem:[%s2675_s5] sm:$0xff] }
 0x1fa   :  { %v983_v12 = vsel %vm978_vm6, %v935_v25, %v969_v8  ;;  %v946_v15 = vsel %vm210_vm2, %v2426_v59, %v921_v28  ;;  %v1925_v59 = vld [vmem:[%s2673_s3 + $0x108] sm:$0xff]  ;;  %v973_v44 = vrot.slane %v944_v16, 4 }
 0x1fb   :  { %v985_v11 = vsel %vm283_vm3, %v983_v12, %v984_v19  ;;  %v968_v52 = vrot.slane %v946_v15, 2  ;;  %1375 = vmatpush.bf16.msra.mxu1 %v1925_v59  ;;  %1493 = vmatpush.bf16.msra.mxu2 %v1931_v17 }
 0x1fc   :  { %994 = vst [vmem:[#allocation1 + $0x1] ss:$4 sm:$0xff] %v985_v11 }
 0x1fd   :  { %v981_v42 = vsel %vm980_vm7, %v967_v9, %v968_v52 }
 0x1fe   :  { %v982_v36 = vsel %vm283_vm3, %v979_v31, %v981_v42 }
 0x1ff   :  { %992 = vst [vmem:[#allocation1] ss:$4 sm:$0xff] %v982_v36  ;;  %1376 = vmatpush.bf16.msra.mxu1 %v1924_v24  ;;  %1494 = vmatpush.bf16.msra.mxu2 %v1930_v63 }
 0x201   :  { %v891_v40 = vpop.permute.xlu1 %890  ;;  %v889_v41 = vpop.permute.xlu0 %888 }
 0x202   :  { %v941_v47 = vsel %vm210_vm2, %v877_v6, %v891_v40  ;;  %v940_v18 = vsel %vm210_vm2, %v876_v22, %v889_v41  ;;  %v987_v6 = vsel %vm980_vm7, %v973_v44, %v974_v58 }
 0x203   :  { %v975_v45 = vrot.slane %v941_v47, 6  ;;  %v972_v60 = vrot.slane %v940_v18, 6  ;;  %1495 = vmatpush.bf16.msra.mxu2 %v1929_v1 }
 0x207   :  { %1496 = vmatpush.bf16.msra.mxu2 %v1928_v20 }
 0x209   :  { %v869_v35 = vpop.permute.xlu1 %868  ;;  %v867_v48 = vpop.permute.xlu0 %866 }
 0x20a   :  { %v937_v26 = vsel %vm210_vm2, %v2434_v4, %v869_v35  ;;  %v936_v7 = vsel %vm210_vm2, %v2453_v13, %v867_v48  ;;  %v1941_v48 = vld [vmem:[%s2676_s6] ss:$0 sm:$0xff] }
 0x20b   :  { %v989_v46 = vsel %vm978_vm6, %v937_v26, %v975_v45  ;;  %v986_v49 = vsel %vm978_vm6, %v936_v7, %v972_v60 }
 0x20c   :  { %v991_v50 = vsel %vm283_vm3, %v989_v46, %v990_v38  ;;  %v988_v51 = vsel %vm283_vm3, %v986_v49, %v987_v6 }
 0x20d   :  { %998 = vst [vmem:[#allocation1 + $0x3] ss:$4 sm:$0xff] %v991_v50 }
 0x20e   :  { %996 = vst [vmem:[#allocation1 + $0x2] ss:$4 sm:$0xff] %v988_v51 }
 0x215   :  { %v1007_v34 = vld.sshfl [vmem:[#allocation1] sm:$0xff pattern:$0x73625140]  ;;  %v1008_v53 = vld.sshfl [vmem:[#allocation1 + $0x8] sm:$0xff pattern:$0x73625140] }
 0x216   :  { %v1017_v4 = vpack.c.bf16 %v1007_v34, %v1007_v34  ;;  %v1018_v55 = vpack.c.bf16 %v1008_v53, %v1008_v53  ;;  %v1009_v21 = vld.sshfl [vmem:[#allocation1 + $0x10] sm:$0xff pattern:$0x73625140]  ;;  %v1010_v13 = vld.sshfl [vmem:[#allocation1 + $0x18] sm:$0xff pattern:$0x73625140] }
 0x217   :  { %v1019_v37 = vpack.c.bf16 %v1009_v21, %v1009_v21  ;;  %v1020_v56 = vpack.c.bf16 %v1010_v13, %v1010_v13 }
 0x218   :  { %1325 = vmatmul.bf16.vlgmr.msrb.gmra.mxu1 %v1017_v4  ;;  %1338 = vmatmul.bf16.vlgmr.msrb.gmra.mxu2 %v1018_v55 }
 0x219   :  { %1351 = vmatmul.bf16.vlgmr.msrb.gmra.mxu3 %v1019_v37  ;;  %1364 = vmatmul.bf16.vlgmr.msra.gmra.mxu0 %v1020_v56 }
 0x228   :  { %1817 = vmatmul.msk.bf16.vlgmr.msra.gmra.mxu1 %vm210_vm2, %v1021_v39 }
 0x295   :  { %v1326_v3 = vpop.f32.mrf.mxu1 }
 0x296   :  { %v1365_v8 = vpop.f32.mrf.mxu0  ;;  %v1327_v54 = vadd.f32 %v1940_v5, %v1326_v3 }
 0x29b   :  { %v1339_v32 = vpop.f32.mrf.mxu2 }
 0x29c   :  { %v1340_v29 = vadd.f32 %v1339_v32, %v1327_v54  ;;  %v1352_v25 = vpop.f32.mrf.mxu3 }
 0x29d   :  { %v1328_v28 = vpop.f32.mrf.mxu1 }
 0x29e   :  { %v1367_v10 = vpop.f32.mrf.mxu0  ;;  %v1353_v19 = vadd.f32 %v1352_v25, %v1340_v29 }
 0x2a0   :  { %v1366_v27 = vadd.f32 %v1365_v8, %v1353_v19 }
 0x2a3   :  { %v1341_v12 = vpop.f32.mrf.mxu2 }
 0x2a4   :  { %v1354_v15 = vpop.f32.mrf.mxu3 }
 0x2a5   :  { %v1378_v9 = vpop.f32.mrf.mxu1 }
 0x2a6   :  { %v1379_v11 = vadd.f32 %v1378_v9, %v1366_v27 }
 0x2a8   :  { %v1382_v52 = vmax.f32 %v1379_v11, 0.0 }
 0x2aa   :  { %v1384_v31 = vrot.slane %v1382_v52, 4  ;;  %v1818_v42 = vrot.slane %v1382_v52, 9  ;;  %v1820_v59 = vrot.slane %v1382_v52, 10  ;;  %v1822_v22 = vrot.slane %v1382_v52, 11 }
 0x2ac   :  { %v1392_v36 = vmax.f32 %v1382_v52, %v1818_v42  ;;  %v1819_v40 = vrot.slane %v1384_v31, 9  ;;  %v1821_v43 = vrot.slane %v1384_v31, 10  ;;  %v1823_v33 = vrot.slane %v1384_v31, 11 }
 0x2ad   :  { %v1380_v41 = vpop.f32.mrf.mxu1 }
 0x2ae   :  { %v1393_v24 = vmax.f32 %v1384_v31, %v1819_v40  ;;  %v1400_v2 = vmax.f32 %v1392_v36, %v1820_v59 }
 0x2b0   :  { %v1401_v16 = vmax.f32 %v1393_v24, %v1821_v43  ;;  %v1408_v47 = vmax.f32 %v1400_v2, %v1822_v22 }
 0x2b2   :  { %v1409_v18 = vmax.f32 %v1401_v16, %v1823_v33  ;;  %v1410_v30 = vpack.c.bf16 %v1408_v47, %v1408_v47 }
 0x2b4   :  { %v1411_v14 = vpack.c.bf16 %v1409_v18, %v1409_v18  ;;  %v1434_v58 = vunpack.c.l.b16 %v1410_v30 }
 0x2b6   :  { %v1435_v44 = vunpack.c.l.b16 %v1411_v14 }
 0x2b8   :  { %v1436_v45 = vrot.slane %v1435_v44, 7 }
 0x2ba   :  { %v1438_v60 = vsel %vm1437_vm8, %v1436_v45, %v1434_v58 }
 0x2bb   :  { %v1439_v35 = vpack.c.b16 %v1438_v60, %v1438_v60 }
 0x2bd   :  { %1497 = vmatmul.bf16.vlgmr.msra.gmra.mxu2 %v1439_v35 }
 0x340   :  { %v1498_v26 = vpop.f32.mrf.mxu2 }
 0x341   :  { %v1499_v7 = vadd.f32 %v1941_v48, %v1498_v26 }
 0x343   :  { %1502 = vst [vmem:[#allocation4] sm:$0x3] %v1499_v7 }
 0x344   :  { %1513 = dma.vmem_to_hbm [thread:$0]  %s1509_s9, 32, %s1511_s12, [#allocation5]  }
 0x348   :  { %v1500_v38 = vpop.f32.mrf.mxu2 }
 0x349   :  { %1966 = dma.done.wait [#allocation5], 32  }
 0x34a   :  { %1967 = vsyncadd [#allocation5], 4294967264 }
 0x34b   :  { %1518 = vsyncpa [#allocation5], 1 }

</bundles_post_ra>
